<compile_context>
chip_gen: v6e
topology: v6e:2x2x1
jax: 0.10.0
libtpu: 0.0.40
codegen_flags: <defaults>
</compile_context>

<pallas_src>
import jax
import jax.numpy as jnp
from jax import lax
from jax.experimental import pallas as pl
from jax.experimental.pallas import tpu as pltpu

LRELU_SLOPE = 0.2
BN_EPS = 1e-5


# ---------------------------------------------------------------------------
# In-kernel helpers (everything operates on lane-dense (rows, W*C) 2-D layouts,
# W-major / C-minor along lanes).
# ---------------------------------------------------------------------------

def _replication_pad_2d(xp_ref, x2d, h, w, c):
    """Fill VMEM scratch ((H+2), (W+2)*C) with the edge-replicated image x2d (H, W*C)."""
    xp_ref[1:h + 1, c:(w + 1) * c] = x2d                               # interior
    xp_ref[0:1, c:(w + 1) * c] = x2d[0:1, :]                           # top row
    xp_ref[h + 1:h + 2, c:(w + 1) * c] = x2d[h - 1:h, :]               # bottom row
    xp_ref[:, 0:c] = xp_ref[:, c:2 * c]                                # left col (+corners)
    xp_ref[:, (w + 1) * c:(w + 2) * c] = xp_ref[:, w * c:(w + 1) * c]  # right col (+corners)


def _banded_conv(xp_ref, rhs_ref, h):
    """3x3 conv as 3 MXU dots: (H,(W+2)*Cin) x ((W+2)*Cin, W*Cout), one per kh tap row.

    The kw/ci structure of the conv is folded into the banded rhs matrices on the host,
    so the output lands directly in the lane-dense (H, W*Cout) layout.
    """
    acc = jnp.dot(xp_ref[0:h, :], rhs_ref[0], preferred_element_type=jnp.float32)
    acc = acc + jnp.dot(xp_ref[1:h + 1, :], rhs_ref[1], preferred_element_type=jnp.float32)
    acc = acc + jnp.dot(xp_ref[2:h + 2, :], rhs_ref[2], preferred_element_type=jnp.float32)
    return acc


def _channel_selector(lanes, c):
    """(lanes, c) 0/1 matrix: sel[l, co] = 1 iff lane l carries channel co (l % c == co)."""
    lane_idx = lax.broadcasted_iota(jnp.int32, (lanes, c), 0)
    chan_idx = lax.broadcasted_iota(jnp.int32, (lanes, c), 1)
    return (lane_idx % c == chan_idx).astype(jnp.float32)


def _channel_tiler(c, lanes):
    """(c, lanes) 0/1 matrix: tiler[co, l] = 1 iff lane l carries channel co."""
    chan_idx = lax.broadcasted_iota(jnp.int32, (c, lanes), 0)
    lane_idx = lax.broadcasted_iota(jnp.int32, (c, lanes), 1)
    return (lane_idx % c == chan_idx).astype(jnp.float32)


def _write_channel_stats(stats_ref, acc, c):
    """Per-sample, per-channel [sum, sum_sq] from a lane-dense (H, W*C) conv output."""
    sel = _channel_selector(acc.shape[1], c)
    colsum = jnp.sum(acc, axis=0, keepdims=True)                       # (1, W*C)
    colsq = jnp.sum(acc * acc, axis=0, keepdims=True)
    stats_ref[0, 0:1, :] = jnp.dot(colsum, sel, preferred_element_type=jnp.float32)
    stats_ref[0, 1:2, :] = jnp.dot(colsq, sel, preferred_element_type=jnp.float32)


def _bn_scale_shift(stats, gamma, beta, m):
    """Fold raw (N, 2, C) partials into per-channel BN scale/shift (training-mode stats)."""
    tot = jnp.sum(stats, axis=0)                                       # (2, C)
    mean = tot[0:1, :] * (1.0 / m)
    var = tot[1:2, :] * (1.0 / m) - mean * mean                        # biased, one-pass
    scale = gamma * lax.rsqrt(var + BN_EPS)
    shift = beta - mean * scale
    return scale, shift                                                # (1, C) each


# ---------------------------------------------------------------------------
# Kernels (one grid step == one sample; grid=(N,) "parallel").
# ---------------------------------------------------------------------------

def _make_conv1_kernel(h, w, c_in, c_out):
    def kernel(x_ref, rhs_ref, y_ref, stats_ref, xp_ref):
        _replication_pad_2d(xp_ref, x_ref[0], h, w, c_in)
        acc = _banded_conv(xp_ref, rhs_ref, h)                         # (H, W*Cout)
        y_ref[0] = acc                                                 # lane-dense store
        _write_channel_stats(stats_ref, acc, c_out)
    return kernel


def _make_bn_conv2_kernel(n, h, w, c_mid, c_out):
    m = float(n * h * w)
    def kernel(y1_ref, stats1_ref, gamma_ref, beta_ref, rhs_ref, y2_ref, stats2_ref, xp_ref):
        # BN-1 affine + LeakyReLU fused onto the incoming rows (scale/shift derived in-kernel
        # from the raw per-sample partials; no pre-tiled HBM rows, no XLA glue between calls).
        scale, shift = _bn_scale_shift(stats1_ref[...], gamma_ref[...], beta_ref[...], m)
        tiler = _channel_tiler(c_mid, w * c_mid)
        scale_row = jnp.dot(scale, tiler, preferred_element_type=jnp.float32)   # (1, W*Cmid)
        shift_row = jnp.dot(shift, tiler, preferred_element_type=jnp.float32)
        x1 = y1_ref[0] * scale_row + shift_row
        x1 = jnp.where(x1 >= 0.0, x1, LRELU_SLOPE * x1)
        # Block-2 conv.
        _replication_pad_2d(xp_ref, x1, h, w, c_mid)
        acc = _banded_conv(xp_ref, rhs_ref, h)                         # (H, W*Cout)
        y2_ref[0] = acc
        _write_channel_stats(stats2_ref, acc, c_out)
    return kernel


def _make_bn_out_kernel(n, h, w, c, row_pack):
    m = float(n * h * w)
    lanes = row_pack * w * c
    def kernel(y_ref, stats_ref, gamma_ref, beta_ref, o_ref):
        scale, shift = _bn_scale_shift(stats_ref[...], gamma_ref[...], beta_ref[...], m)
        tiler = _channel_tiler(c, lanes)
        scale_row = jnp.dot(scale, tiler, preferred_element_type=jnp.float32)   # (1, lanes)
        shift_row = jnp.dot(shift, tiler, preferred_element_type=jnp.float32)
        y = y_ref[0] * scale_row + shift_row                           # (H/row_pack, 128)
        o_ref[0] = jnp.where(y >= 0.0, y, LRELU_SLOPE * y)             # unmasked full-lane vst
    return kernel


# ---------------------------------------------------------------------------
# Host-side weight preparation: fold the 3x3 kw/ci structure into banded matrices
# so the in-kernel conv is 3 plain MXU dots with a lane-dense output.
# ---------------------------------------------------------------------------

def _banded_conv_weights(w_oihw, w_spatial):
    """(Cout,Cin,3,3) torch conv weight -> (3, (W+2)*Cin, W*Cout) banded matrices.

    rhs[kh][(wp)*Cin+ci, ww*Cout+co] = W[co,ci,kh,wp-ww] for wp-ww in {0,1,2}, else 0,
    so that  out[h, ww*Cout+co] = sum_kh  xp[h+kh, :] @ rhs[kh].
    Built once per forward with a few tiny XLA ops.
    """
    c_out, c_in = w_oihw.shape[0], w_oihw.shape[1]
    wt = jnp.transpose(w_oihw, (2, 3, 1, 0)).astype(jnp.float32)       # (3, 3, Cin, Cout)
    eye_w = jnp.eye(w_spatial, dtype=jnp.float32)                      # (W, W)
    bd = jnp.einsum("uv,hkio->hkuivo", eye_w, wt)                      # (3,3,W,Cin,W,Cout)
    bd = bd.reshape(3, 3, w_spatial * c_in, w_spatial * c_out)
    rhs = jnp.zeros((3, (w_spatial + 2) * c_in, w_spatial * c_out), jnp.float32)
    for kw in range(3):
        rhs = rhs.at[:, kw * c_in:(kw + w_spatial) * c_in, :].add(bd[:, kw])
    return rhs


# ---------------------------------------------------------------------------
# Forward wrapper.
# ---------------------------------------------------------------------------

def unet_conv_forward(x_nchw, params):
    """UnetConv('DIP', C, C, ln_lambda=0).forward — PyTorch NCHW in/out, lane-dense inside."""
    x = jnp.transpose(x_nchw, (0, 2, 3, 1)).astype(jnp.float32)        # NHWC
    n, h, w, c = x.shape
    c1 = params["w1"].shape[0]
    c2 = params["w2"].shape[0]

    x2d = x.reshape(n, h, w * c)                                       # contiguous, W-major/C-minor lanes
    rhs1 = _banded_conv_weights(params["w1"], w)                       # (3, (W+2)*C,  W*C1)
    rhs2 = _banded_conv_weights(params["w2"], w)                       # (3, (W+2)*C1, W*C2)
    g1 = params["g1"].reshape(1, c1).astype(jnp.float32)
    b1 = params["be1"].reshape(1, c1).astype(jnp.float32)
    g2 = params["g2"].reshape(1, c2).astype(jnp.float32)
    b2 = params["be2"].reshape(1, c2).astype(jnp.float32)

    par = pltpu.CompilerParams(dimension_semantics=("parallel",))

    # ---- Kernel A: in-VMEM RepPad + conv1 (MXU) + per-sample channel stats ----
    y1, s1 = pl.pallas_call(
        _make_conv1_kernel(h, w, c, c1),
        out_shape=(jax.ShapeDtypeStruct((n, h, w * c1), jnp.float32),
                   jax.ShapeDtypeStruct((n, 2, c1), jnp.float32)),
        grid=(n,),
        in_specs=[pl.BlockSpec((1, h, w * c), lambda i: (i, 0, 0)),
                  pl.BlockSpec((3, (w + 2) * c, w * c1), lambda i: (0, 0, 0))],
        out_specs=(pl.BlockSpec((1, h, w * c1), lambda i: (i, 0, 0)),
                   pl.BlockSpec((1, 2, c1), lambda i: (i, 0, 0))),
        scratch_shapes=[pltpu.VMEM((h + 2, (w + 2) * c), jnp.float32)],
        compiler_params=par,
    )(x2d, rhs1)

    # ---- Kernel B: BN1 affine + LeakyReLU fused with RepPad + conv2 + stats ----
    y2, s2 = pl.pallas_call(
        _make_bn_conv2_kernel(n, h, w, c1, c2),
        out_shape=(jax.ShapeDtypeStruct((n, h, w * c2), jnp.float32),
                   jax.ShapeDtypeStruct((n, 2, c2), jnp.float32)),
        grid=(n,),
        in_specs=[pl.BlockSpec((1, h, w * c1), lambda i: (i, 0, 0)),
                  pl.BlockSpec((n, 2, c1), lambda i: (0, 0, 0)),
                  pl.BlockSpec((1, c1), lambda i: (0, 0)),
                  pl.BlockSpec((1, c1), lambda i: (0, 0)),
                  pl.BlockSpec((3, (w + 2) * c1, w * c2), lambda i: (0, 0, 0))],
        out_specs=(pl.BlockSpec((1, h, w * c2), lambda i: (i, 0, 0)),
                   pl.BlockSpec((1, 2, c2), lambda i: (i, 0, 0))),
        scratch_shapes=[pltpu.VMEM((h + 2, (w + 2) * c1), jnp.float32)],
        compiler_params=par,
    )(y1, s1, g1, b1, rhs2)

    # ---- Kernel C: BN2 affine + LeakyReLU on full-128-lane slabs ----
    row_pack = 2 if h % 2 == 0 else 1
    rows = h // row_pack
    lanes = row_pack * w * c2
    y2_wide = y2.reshape(n, rows, lanes)                               # contiguous view
    out = pl.pallas_call(
        _make_bn_out_kernel(n, h, w, c2, row_pack),
        out_shape=jax.ShapeDtypeStruct((n, rows, lanes), jnp.float32),
        grid=(n,),
        in_specs=[pl.BlockSpec((1, rows, lanes), lambda i: (i, 0, 0)),
                  pl.BlockSpec((n, 2, c2), lambda i: (0, 0, 0)),
                  pl.BlockSpec((1, c2), lambda i: (0, 0)),
                  pl.BlockSpec((1, c2), lambda i: (0, 0))],
        out_specs=pl.BlockSpec((1, rows, lanes), lambda i: (i, 0, 0)),
        compiler_params=par,
    )(y2_wide, s2, g2, b2)

    return jnp.transpose(out.reshape(n, h, w, c2), (0, 3, 1, 2))       # back to NCHW


# ---------------------------------------------------------------------------
# Pure-JAX f32 reference (includes the conv bias; training-mode BN cancels it).
# ---------------------------------------------------------------------------

def _ref_forward(x_nchw, params):
    def block(x, w, b, g, beta):
        xp = jnp.pad(x, ((0, 0), (0, 0), (1, 1), (1, 1)), mode="edge")
        y = lax.conv_general_dilated(
            xp, w, (1, 1), "VALID", dimension_numbers=("NCHW", "OIHW", "NCHW"))
        y = y + b[None, :, None, None]
        mean = jnp.mean(y, axis=(0, 2, 3), keepdims=True)
        var = jnp.mean((y - mean) ** 2, axis=(0, 2, 3), keepdims=True)
        y = (y - mean) / jnp.sqrt(var + BN_EPS)
        y = y * g[None, :, None, None] + beta[None, :, None, None]
        return jnp.where(y >= 0, y, LRELU_SLOPE * y)

    y = block(x_nchw, params["w1"], params["b1"], params["g1"], params["be1"])
    y = block(y, params["w2"], params["b2"], params["g2"], params["be2"])
    return y


def _init_params(key, c):
    k1, k2, k3, k4 = jax.random.split(key, 4)
    # Deterministic synthetic init (PyTorch-like scale); BN affine at PyTorch defaults.
    # Biases b1/b2 are only used by the reference: a per-channel bias before training-mode
    # BatchNorm cancels exactly, so the kernels drop it.
    return {
        "w1": jax.random.normal(k1, (c, c, 3, 3), jnp.float32) * 0.1,
        "b1": jax.random.normal(k2, (c,), jnp.float32) * 0.05,
        "g1": jnp.ones((c,), jnp.float32),
        "be1": jnp.zeros((c,), jnp.float32),
        "w2": jax.random.normal(k3, (c, c, 3, 3), jnp.float32) * 0.1,
        "b2": jax.random.normal(k4, (c,), jnp.float32) * 0.05,
        "g2": jnp.ones((c,), jnp.float32),
        "be2": jnp.zeros((c,), jnp.float32),
    }


if __name__ == "__main__":
    # UnetConv('DIP', input_channel=4, output_channel=4, ln_lambda=0)
    N, C, H, W = 2, 4, 16, 16
    key = jax.random.PRNGKey(0)
    kx, kp = jax.random.split(key)
    x = jax.random.normal(kx, (N, C, H, W), jnp.float32)
    params = _init_params(kp, C)

    fwd = jax.jit(unet_conv_forward)
    out = jax.block_until_ready(fwd(x, params))
    ref = jax.block_until_ready(_ref_forward(x, params))

    assert out.shape == (N, C, H, W)
    assert jnp.allclose(out, ref, rtol=1e-4, atol=1e-4), "Pallas kernel mismatch vs JAX reference"
    print("KERNEL_OK")
</pallas_src>

<mosaic_0001>
module attributes {stable_mosaic.version = 11 : i64} {
  func.func @kernel(%arg0: i32, %arg1: memref<1x16x64xf32, #tpu.memory_space<vmem>>, %arg2: memref<3x72x64xf32, #tpu.memory_space<vmem>>, %arg3: memref<1x16x64xf32, #tpu.memory_space<vmem>>, %arg4: memref<1x2x4xf32, #tpu.memory_space<vmem>>, %arg5: memref<18x72xf32, #tpu.memory_space<vmem>>) attributes {dimension_semantics = [#tpu.dimension_semantics<parallel>], iteration_bounds = array<i64: 2>, scalar_prefetch = 0 : i64, scratch_operands = 1 : i64, tpu.core_type = #tpu.core_type<tc>, window_params = [{transform_indices = @transform_0, window_bounds = array<i64: 1, 16, 64>}, {pipeline_mode = #tpu.pipeline_mode<synchronous>, transform_indices = @transform_1, window_bounds = array<i64: 3, 72, 64>}, {transform_indices = @transform_2, window_bounds = array<i64: 1, 16, 64>}, {transform_indices = @transform_3, window_bounds = array<i64: 1, 2, 4>}]} {
    %c0 = arith.constant 0 : index
    %c0_0 = arith.constant 0 : index
    %c0_1 = arith.constant 0 : index
    %0 = vector.load %arg1[%c0, %c0_0, %c0_1] : memref<1x16x64xf32, #tpu.memory_space<vmem>>, vector<1x16x64xf32>
    %1 = vector.shape_cast %0 : vector<1x16x64xf32> to vector<16x64xf32>
    %c1 = arith.constant 1 : index
    %c4 = arith.constant 4 : index
    %2 = vector.load %arg5[%c1, %c4] : memref<18x72xf32, #tpu.memory_space<vmem>>, vector<16x64xf32>
    tpu.vector_store %arg5[%c1, %c4], %1 {strides = array<i32>} : memref<18x72xf32, #tpu.memory_space<vmem>>, vector<16x64xf32>,
    %3 = vector.extract_strided_slice %1 {offsets = [0, 0], sizes = [1, 64], strides = [1, 1]} : vector<16x64xf32> to vector<1x64xf32>
    %c0_2 = arith.constant 0 : index
    %c4_3 = arith.constant 4 : index
    %4 = vector.load %arg5[%c0_2, %c4_3] : memref<18x72xf32, #tpu.memory_space<vmem>>, vector<1x64xf32>
    tpu.vector_store %arg5[%c0_2, %c4_3], %3 {strides = array<i32>} : memref<18x72xf32, #tpu.memory_space<vmem>>, vector<1x64xf32>,
    %5 = vector.extract_strided_slice %1 {offsets = [15, 0], sizes = [1, 64], strides = [1, 1]} : vector<16x64xf32> to vector<1x64xf32>
    %c17 = arith.constant 17 : index
    %c4_4 = arith.constant 4 : index
    %6 = vector.load %arg5[%c17, %c4_4] : memref<18x72xf32, #tpu.memory_space<vmem>>, vector<1x64xf32>
    tpu.vector_store %arg5[%c17, %c4_4], %5 {strides = array<i32>} : memref<18x72xf32, #tpu.memory_space<vmem>>, vector<1x64xf32>,
    %c0_5 = arith.constant 0 : index
    %c4_6 = arith.constant 4 : index
    %7 = vector.load %arg5[%c0_5, %c4_6] : memref<18x72xf32, #tpu.memory_space<vmem>>, vector<18x4xf32>
    %c0_7 = arith.constant 0 : index
    %c0_8 = arith.constant 0 : index
    %8 = vector.load %arg5[%c0_7, %c0_8] : memref<18x72xf32, #tpu.memory_space<vmem>>, vector<18x4xf32>
    tpu.vector_store %arg5[%c0_7, %c0_8], %7 {strides = array<i32>} : memref<18x72xf32, #tpu.memory_space<vmem>>, vector<18x4xf32>,
    %c0_9 = arith.constant 0 : index
    %c64 = arith.constant 64 : index
    %9 = vector.load %arg5[%c0_9, %c64] : memref<18x72xf32, #tpu.memory_space<vmem>>, vector<18x4xf32>
    %c0_10 = arith.constant 0 : index
    %c68 = arith.constant 68 : index
    %10 = vector.load %arg5[%c0_10, %c68] : memref<18x72xf32, #tpu.memory_space<vmem>>, vector<18x4xf32>
    tpu.vector_store %arg5[%c0_10, %c68], %9 {strides = array<i32>} : memref<18x72xf32, #tpu.memory_space<vmem>>, vector<18x4xf32>,
    %c0_11 = arith.constant 0 : index
    %c0_12 = arith.constant 0 : index
    %11 = vector.load %arg5[%c0_11, %c0_12] : memref<18x72xf32, #tpu.memory_space<vmem>>, vector<16x72xf32>
    %c0_13 = arith.constant 0 : index
    %c0_14 = arith.constant 0 : index
    %c0_15 = arith.constant 0 : index
    %12 = vector.load %arg2[%c0_13, %c0_14, %c0_15] : memref<3x72x64xf32, #tpu.memory_space<vmem>>, vector<1x72x64xf32>
    %13 = vector.shape_cast %12 : vector<1x72x64xf32> to vector<72x64xf32>
    %cst = arith.constant dense<0.000000e+00> : vector<16x64xf32>
    %14 = tpu.matmul %11, %13, %cst {dimension_numbers = #tpu.dot_dimension_numbers<[1], [0], [0], [1], [0, 0, 1, 1], [], []>} : vector<16x72xf32>, vector<72x64xf32>, vector<16x64xf32> -> vector<16x64xf32>
    %c1_16 = arith.constant 1 : index
    %c0_17 = arith.constant 0 : index
    %15 = vector.load %arg5[%c1_16, %c0_17] : memref<18x72xf32, #tpu.memory_space<vmem>>, vector<16x72xf32>
    %c1_18 = arith.constant 1 : index
    %c0_19 = arith.constant 0 : index
    %c0_20 = arith.constant 0 : index
    %16 = vector.load %arg2[%c1_18, %c0_19, %c0_20] : memref<3x72x64xf32, #tpu.memory_space<vmem>>, vector<1x72x64xf32>
    %17 = vector.shape_cast %16 : vector<1x72x64xf32> to vector<72x64xf32>
    %cst_21 = arith.constant dense<0.000000e+00> : vector<16x64xf32>
    %18 = tpu.matmul %15, %17, %cst_21 {dimension_numbers = #tpu.dot_dimension_numbers<[1], [0], [0], [1], [0, 0, 1, 1], [], []>} : vector<16x72xf32>, vector<72x64xf32>, vector<16x64xf32> -> vector<16x64xf32>
    %19 = arith.addf %14, %18 : vector<16x64xf32>
    %c2 = arith.constant 2 : index
    %c0_22 = arith.constant 0 : index
    %20 = vector.load %arg5[%c2, %c0_22] : memref<18x72xf32, #tpu.memory_space<vmem>>, vector<16x72xf32>
    %c2_23 = arith.constant 2 : index
    %c0_24 = arith.constant 0 : index
    %c0_25 = arith.constant 0 : index
    %21 = vector.load %arg2[%c2_23, %c0_24, %c0_25] : memref<3x72x64xf32, #tpu.memory_space<vmem>>, vector<1x72x64xf32>
    %22 = vector.shape_cast %21 : vector<1x72x64xf32> to vector<72x64xf32>
    %cst_26 = arith.constant dense<0.000000e+00> : vector<16x64xf32>
    %23 = tpu.matmul %20, %22, %cst_26 {dimension_numbers = #tpu.dot_dimension_numbers<[1], [0], [0], [1], [0, 0, 1, 1], [], []>} : vector<16x72xf32>, vector<72x64xf32>, vector<16x64xf32> -> vector<16x64xf32>
    %24 = arith.addf %19, %23 : vector<16x64xf32>
    %c0_27 = arith.constant 0 : index
    %c0_28 = arith.constant 0 : index
    %c0_29 = arith.constant 0 : index
    %25 = vector.load %arg3[%c0_27, %c0_28, %c0_29] : memref<1x16x64xf32, #tpu.memory_space<vmem>>, vector<1x16x64xf32>
    %26 = vector.shape_cast %25 : vector<1x16x64xf32> to vector<16x64xf32>
    %27 = vector.shape_cast %24 : vector<16x64xf32> to vector<1x16x64xf32>
    tpu.vector_store %arg3[%c0_27, %c0_28, %c0_29], %27 {strides = array<i32>} : memref<1x16x64xf32, #tpu.memory_space<vmem>>, vector<1x16x64xf32>,
    %28 = tpu.iota {dimensions = array<i32: 0>} : vector<64x4xi32>
    %29 = tpu.iota {dimensions = array<i32: 1>} : vector<64x4xi32>
    %c4_i32 = arith.constant 4 : i32
    %c0_i32 = arith.constant 0 : i32
    %30 = arith.cmpi eq, %c4_i32, %c0_i32 : i32
    %c1_i32 = arith.constant 1 : i32
    %31 = arith.select %30, %c1_i32, %c4_i32 : i32
    %32 = vector.broadcast %31 : i32 to vector<64x4xi32>
    %33 = arith.remsi %28, %32 : vector<64x4xi32>
    %c0_i32_30 = arith.constant 0 : i32
    %34 = vector.broadcast %c0_i32_30 : i32 to vector<64x4xi32>
    %35 = arith.cmpi ne, %33, %34 : vector<64x4xi32>
    %c0_i32_31 = arith.constant 0 : i32
    %36 = vector.broadcast %c0_i32_31 : i32 to vector<64x4xi32>
    %37 = arith.cmpi slt, %33, %36 : vector<64x4xi32>
    %c0_i32_32 = arith.constant 0 : i32
    %38 = arith.cmpi slt, %31, %c0_i32_32 : i32
    %39 = vector.broadcast %38 : i1 to vector<64x4xi1>
    %40 = vector.broadcast %39 : vector<64x4xi1> to vector<64x4xi1>
    %41 = arith.xori %37, %40 : vector<64x4xi1>
    %42 = arith.andi %41, %35 : vector<64x4xi1>
    %43 = vector.broadcast %31 : i32 to vector<64x4xi32>
    %44 = arith.addi %33, %43 : vector<64x4xi32>
    %45 = arith.select %42, %44, %33 : vector<64x4xi1>, vector<64x4xi32>
    %46 = arith.cmpi eq, %45, %29 : vector<64x4xi32>
    %47 = arith.extui %46 : vector<64x4xi1> to vector<64x4xi32>
    %48 = arith.sitofp %47 : vector<64x4xi32> to vector<64x4xf32>
    %cst_33 = arith.constant dense<0.000000e+00> : vector<64xf32>
    %49 = vector.multi_reduction <add>, %24, %cst_33 [0] : vector<16x64xf32> to vector<64xf32>
    %50 = vector.shape_cast %49 : vector<64xf32> to vector<1x64xf32>
    %51 = arith.mulf %24, %24 : vector<16x64xf32>
    %cst_34 = arith.constant dense<0.000000e+00> : vector<64xf32>
    %52 = vector.multi_reduction <add>, %51, %cst_34 [0] : vector<16x64xf32> to vector<64xf32>
    %53 = vector.shape_cast %52 : vector<64xf32> to vector<1x64xf32>
    %cst_35 = arith.constant dense<0.000000e+00> : vector<1x4xf32>
    %54 = tpu.matmul %50, %48, %cst_35 {dimension_numbers = #tpu.dot_dimension_numbers<[1], [0], [0], [1], [0, 0, 1, 1], [], []>} : vector<1x64xf32>, vector<64x4xf32>, vector<1x4xf32> -> vector<1x4xf32>
    %c0_36 = arith.constant 0 : index
    %c0_37 = arith.constant 0 : index
    %c0_38 = arith.constant 0 : index
    %55 = vector.load %arg4[%c0_36, %c0_37, %c0_38] : memref<1x2x4xf32, #tpu.memory_space<vmem>>, vector<1x1x4xf32>
    %56 = vector.shape_cast %55 : vector<1x1x4xf32> to vector<1x4xf32>
    %57 = vector.shape_cast %54 : vector<1x4xf32> to vector<1x1x4xf32>
    tpu.vector_store %arg4[%c0_36, %c0_37, %c0_38], %57 {strides = array<i32>} : memref<1x2x4xf32, #tpu.memory_space<vmem>>, vector<1x1x4xf32>,
    %cst_39 = arith.constant dense<0.000000e+00> : vector<1x4xf32>
    %58 = tpu.matmul %53, %48, %cst_39 {dimension_numbers = #tpu.dot_dimension_numbers<[1], [0], [0], [1], [0, 0, 1, 1], [], []>} : vector<1x64xf32>, vector<64x4xf32>, vector<1x4xf32> -> vector<1x4xf32>
    %c0_40 = arith.constant 0 : index
    %c1_41 = arith.constant 1 : index
    %c0_42 = arith.constant 0 : index
    %59 = vector.load %arg4[%c0_40, %c1_41, %c0_42] : memref<1x2x4xf32, #tpu.memory_space<vmem>>, vector<1x1x4xf32>
    %60 = vector.shape_cast %59 : vector<1x1x4xf32> to vector<1x4xf32>
    %61 = vector.shape_cast %58 : vector<1x4xf32> to vector<1x1x4xf32>
    tpu.vector_store %arg4[%c0_40, %c1_41, %c0_42], %61 {strides = array<i32>} : memref<1x2x4xf32, #tpu.memory_space<vmem>>, vector<1x1x4xf32>,
    return
  }
  func.func @transform_0(%arg0: i32) -> (i32, i32, i32) {
    %c0_i32 = arith.constant 0 : i32
    %c0_i32_0 = arith.constant 0 : i32
    %c0_i32_1 = arith.constant 0 : i32
    return %arg0, %c0_i32, %c0_i32_0 : i32, i32, i32
  }
  func.func @transform_1(%arg0: i32) -> (i32, i32, i32) {
    %c0_i32 = arith.constant 0 : i32
    %c0_i32_0 = arith.constant 0 : i32
    %c0_i32_1 = arith.constant 0 : i32
    %c0_i32_2 = arith.constant 0 : i32
    return %c0_i32, %c0_i32_0, %c0_i32_1 : i32, i32, i32
  }
  func.func @transform_2(%arg0: i32) -> (i32, i32, i32) {
    %c0_i32 = arith.constant 0 : i32
    %c0_i32_0 = arith.constant 0 : i32
    %c0_i32_1 = arith.constant 0 : i32
    return %arg0, %c0_i32, %c0_i32_0 : i32, i32, i32
  }
  func.func @transform_3(%arg0: i32) -> (i32, i32, i32) {
    %c0_i32 = arith.constant 0 : i32
    %c0_i32_0 = arith.constant 0 : i32
    %c0_i32_1 = arith.constant 0 : i32
    return %arg0, %c0_i32, %c0_i32_0 : i32, i32, i32
  }
}

module attributes {stable_mosaic.version = 11 : i64} {
  func.func @kernel(%arg0: i32, %arg1: memref<1x16x64xf32, #tpu.memory_space<vmem>>, %arg2: memref<2x2x4xf32, #tpu.memory_space<vmem>>, %arg3: memref<1x4xf32, #tpu.memory_space<vmem>>, %arg4: memref<1x4xf32, #tpu.memory_space<vmem>>, %arg5: memref<3x72x64xf32, #tpu.memory_space<vmem>>, %arg6: memref<1x16x64xf32, #tpu.memory_space<vmem>>, %arg7: memref<1x2x4xf32, #tpu.memory_space<vmem>>, %arg8: memref<18x72xf32, #tpu.memory_space<vmem>>) attributes {dimension_semantics = [#tpu.dimension_semantics<parallel>], iteration_bounds = array<i64: 2>, scalar_prefetch = 0 : i64, scratch_operands = 1 : i64, tpu.core_type = #tpu.core_type<tc>, window_params = [{transform_indices = @transform_0, window_bounds = array<i64: 1, 16, 64>}, {pipeline_mode = #tpu.pipeline_mode<synchronous>, transform_indices = @transform_1, window_bounds = array<i64: 2, 2, 4>}, {pipeline_mode = #tpu.pipeline_mode<synchronous>, transform_indices = @transform_2, window_bounds = array<i64: 1, 4>}, {pipeline_mode = #tpu.pipeline_mode<synchronous>, transform_indices = @transform_3, window_bounds = array<i64: 1, 4>}, {pipeline_mode = #tpu.pipeline_mode<synchronous>, transform_indices = @transform_4, window_bounds = array<i64: 3, 72, 64>}, {transform_indices = @transform_5, window_bounds = array<i64: 1, 16, 64>}, {transform_indices = @transform_6, window_bounds = array<i64: 1, 2, 4>}]} {
    %c0 = arith.constant 0 : index
    %c0_0 = arith.constant 0 : index
    %c0_1 = arith.constant 0 : index
    %0 = vector.load %arg2[%c0, %c0_0, %c0_1] : memref<2x2x4xf32, #tpu.memory_space<vmem>>, vector<2x2x4xf32>
    %c0_2 = arith.constant 0 : index
    %c0_3 = arith.constant 0 : index
    %1 = vector.load %arg3[%c0_2, %c0_3] : memref<1x4xf32, #tpu.memory_space<vmem>>, vector<1x4xf32>
    %c0_4 = arith.constant 0 : index
    %c0_5 = arith.constant 0 : index
    %2 = vector.load %arg4[%c0_4, %c0_5] : memref<1x4xf32, #tpu.memory_space<vmem>>, vector<1x4xf32>
    %cst = arith.constant dense<0.000000e+00> : vector<2x4xf32>
    %3 = vector.multi_reduction <add>, %0, %cst [0] : vector<2x2x4xf32> to vector<2x4xf32>
    %4 = vector.extract_strided_slice %3 {offsets = [0, 0], sizes = [1, 4], strides = [1, 1]} : vector<2x4xf32> to vector<1x4xf32>
    %cst_6 = arith.constant 0.001953125 : f32
    %5 = vector.broadcast %cst_6 : f32 to vector<1x4xf32>
    %6 = arith.mulf %4, %5 : vector<1x4xf32>
    %7 = vector.extract_strided_slice %3 {offsets = [1, 0], sizes = [1, 4], strides = [1, 1]} : vector<2x4xf32> to vector<1x4xf32>
    %cst_7 = arith.constant 0.001953125 : f32
    %8 = vector.broadcast %cst_7 : f32 to vector<1x4xf32>
    %9 = arith.mulf %7, %8 : vector<1x4xf32>
    %10 = arith.mulf %6, %6 : vector<1x4xf32>
    %11 = arith.subf %9, %10 : vector<1x4xf32>
    %cst_8 = arith.constant 9.99999974E-6 : f32
    %12 = vector.broadcast %cst_8 : f32 to vector<1x4xf32>
    %13 = arith.addf %11, %12 : vector<1x4xf32>
    %14 = math.rsqrt %13 : vector<1x4xf32>
    %15 = arith.mulf %1, %14 : vector<1x4xf32>
    %16 = arith.mulf %6, %15 : vector<1x4xf32>
    %17 = arith.subf %2, %16 : vector<1x4xf32>
    %18 = tpu.iota {dimensions = array<i32: 0>} : vector<4x64xi32>
    %19 = tpu.iota {dimensions = array<i32: 1>} : vector<4x64xi32>
    %c4_i32 = arith.constant 4 : i32
    %c0_i32 = arith.constant 0 : i32
    %20 = arith.cmpi eq, %c4_i32, %c0_i32 : i32
    %c1_i32 = arith.constant 1 : i32
    %21 = arith.select %20, %c1_i32, %c4_i32 : i32
    %22 = vector.broadcast %21 : i32 to vector<4x64xi32>
    %23 = arith.remsi %19, %22 : vector<4x64xi32>
    %c0_i32_9 = arith.constant 0 : i32
    %24 = vector.broadcast %c0_i32_9 : i32 to vector<4x64xi32>
    %25 = arith.cmpi ne, %23, %24 : vector<4x64xi32>
    %c0_i32_10 = arith.constant 0 : i32
    %26 = vector.broadcast %c0_i32_10 : i32 to vector<4x64xi32>
    %27 = arith.cmpi slt, %23, %26 : vector<4x64xi32>
    %c0_i32_11 = arith.constant 0 : i32
    %28 = arith.cmpi slt, %21, %c0_i32_11 : i32
    %29 = vector.broadcast %28 : i1 to vector<4x64xi1>
    %30 = vector.broadcast %29 : vector<4x64xi1> to vector<4x64xi1>
    %31 = arith.xori %27, %30 : vector<4x64xi1>
    %32 = arith.andi %31, %25 : vector<4x64xi1>
    %33 = vector.broadcast %21 : i32 to vector<4x64xi32>
    %34 = arith.addi %23, %33 : vector<4x64xi32>
    %35 = arith.select %32, %34, %23 : vector<4x64xi1>, vector<4x64xi32>
    %36 = arith.cmpi eq, %35, %18 : vector<4x64xi32>
    %37 = arith.extui %36 : vector<4x64xi1> to vector<4x64xi32>
    %38 = arith.sitofp %37 : vector<4x64xi32> to vector<4x64xf32>
    %cst_12 = arith.constant dense<0.000000e+00> : vector<1x64xf32>
    %39 = tpu.matmul %15, %38, %cst_12 {dimension_numbers = #tpu.dot_dimension_numbers<[1], [0], [0], [1], [0, 0, 1, 1], [], []>} : vector<1x4xf32>, vector<4x64xf32>, vector<1x64xf32> -> vector<1x64xf32>
    %cst_13 = arith.constant dense<0.000000e+00> : vector<1x64xf32>
    %40 = tpu.matmul %17, %38, %cst_13 {dimension_numbers = #tpu.dot_dimension_numbers<[1], [0], [0], [1], [0, 0, 1, 1], [], []>} : vector<1x4xf32>, vector<4x64xf32>, vector<1x64xf32> -> vector<1x64xf32>
    %c0_14 = arith.constant 0 : index
    %c0_15 = arith.constant 0 : index
    %c0_16 = arith.constant 0 : index
    %41 = vector.load %arg1[%c0_14, %c0_15, %c0_16] : memref<1x16x64xf32, #tpu.memory_space<vmem>>, vector<1x16x64xf32>
    %42 = vector.shape_cast %41 : vector<1x16x64xf32> to vector<16x64xf32>
    %43 = vector.broadcast %39 : vector<1x64xf32> to vector<16x64xf32>
    %44 = arith.mulf %42, %43 : vector<16x64xf32>
    %45 = vector.broadcast %40 : vector<1x64xf32> to vector<16x64xf32>
    %46 = arith.addf %44, %45 : vector<16x64xf32>
    %cst_17 = arith.constant 0.000000e+00 : f32
    %47 = vector.broadcast %cst_17 : f32 to vector<16x64xf32>
    %48 = arith.cmpf oge, %46, %47 : vector<16x64xf32>
    %cst_18 = arith.constant 2.000000e-01 : f32
    %49 = vector.broadcast %cst_18 : f32 to vector<16x64xf32>
    %50 = arith.mulf %49, %46 : vector<16x64xf32>
    %51 = arith.select %48, %46, %50 : vector<16x64xi1>, vector<16x64xf32>
    %c1 = arith.constant 1 : index
    %c4 = arith.constant 4 : index
    %52 = vector.load %arg8[%c1, %c4] : memref<18x72xf32, #tpu.memory_space<vmem>>, vector<16x64xf32>
    tpu.vector_store %arg8[%c1, %c4], %51 {strides = array<i32>} : memref<18x72xf32, #tpu.memory_space<vmem>>, vector<16x64xf32>,
    %53 = vector.extract_strided_slice %51 {offsets = [0, 0], sizes = [1, 64], strides = [1, 1]} : vector<16x64xf32> to vector<1x64xf32>
    %c0_19 = arith.constant 0 : index
    %c4_20 = arith.constant 4 : index
    %54 = vector.load %arg8[%c0_19, %c4_20] : memref<18x72xf32, #tpu.memory_space<vmem>>, vector<1x64xf32>
    tpu.vector_store %arg8[%c0_19, %c4_20], %53 {strides = array<i32>} : memref<18x72xf32, #tpu.memory_space<vmem>>, vector<1x64xf32>,
    %55 = vector.extract_strided_slice %51 {offsets = [15, 0], sizes = [1, 64], strides = [1, 1]} : vector<16x64xf32> to vector<1x64xf32>
    %c17 = arith.constant 17 : index
    %c4_21 = arith.constant 4 : index
    %56 = vector.load %arg8[%c17, %c4_21] : memref<18x72xf32, #tpu.memory_space<vmem>>, vector<1x64xf32>
    tpu.vector_store %arg8[%c17, %c4_21], %55 {strides = array<i32>} : memref<18x72xf32, #tpu.memory_space<vmem>>, vector<1x64xf32>,
    %c0_22 = arith.constant 0 : index
    %c4_23 = arith.constant 4 : index
    %57 = vector.load %arg8[%c0_22, %c4_23] : memref<18x72xf32, #tpu.memory_space<vmem>>, vector<18x4xf32>
    %c0_24 = arith.constant 0 : index
    %c0_25 = arith.constant 0 : index
    %58 = vector.load %arg8[%c0_24, %c0_25] : memref<18x72xf32, #tpu.memory_space<vmem>>, vector<18x4xf32>
    tpu.vector_store %arg8[%c0_24, %c0_25], %57 {strides = array<i32>} : memref<18x72xf32, #tpu.memory_space<vmem>>, vector<18x4xf32>,
    %c0_26 = arith.constant 0 : index
    %c64 = arith.constant 64 : index
    %59 = vector.load %arg8[%c0_26, %c64] : memref<18x72xf32, #tpu.memory_space<vmem>>, vector<18x4xf32>
    %c0_27 = arith.constant 0 : index
    %c68 = arith.constant 68 : index
    %60 = vector.load %arg8[%c0_27, %c68] : memref<18x72xf32, #tpu.memory_space<vmem>>, vector<18x4xf32>
    tpu.vector_store %arg8[%c0_27, %c68], %59 {strides = array<i32>} : memref<18x72xf32, #tpu.memory_space<vmem>>, vector<18x4xf32>,
    %c0_28 = arith.constant 0 : index
    %c0_29 = arith.constant 0 : index
    %61 = vector.load %arg8[%c0_28, %c0_29] : memref<18x72xf32, #tpu.memory_space<vmem>>, vector<16x72xf32>
    %c0_30 = arith.constant 0 : index
    %c0_31 = arith.constant 0 : index
    %c0_32 = arith.constant 0 : index
    %62 = vector.load %arg5[%c0_30, %c0_31, %c0_32] : memref<3x72x64xf32, #tpu.memory_space<vmem>>, vector<1x72x64xf32>
    %63 = vector.shape_cast %62 : vector<1x72x64xf32> to vector<72x64xf32>
    %cst_33 = arith.constant dense<0.000000e+00> : vector<16x64xf32>
    %64 = tpu.matmul %61, %63, %cst_33 {dimension_numbers = #tpu.dot_dimension_numbers<[1], [0], [0], [1], [0, 0, 1, 1], [], []>} : vector<16x72xf32>, vector<72x64xf32>, vector<16x64xf32> -> vector<16x64xf32>
    %c1_34 = arith.constant 1 : index
    %c0_35 = arith.constant 0 : index
    %65 = vector.load %arg8[%c1_34, %c0_35] : memref<18x72xf32, #tpu.memory_space<vmem>>, vector<16x72xf32>
    %c1_36 = arith.constant 1 : index
    %c0_37 = arith.constant 0 : index
    %c0_38 = arith.constant 0 : index
    %66 = vector.load %arg5[%c1_36, %c0_37, %c0_38] : memref<3x72x64xf32, #tpu.memory_space<vmem>>, vector<1x72x64xf32>
    %67 = vector.shape_cast %66 : vector<1x72x64xf32> to vector<72x64xf32>
    %cst_39 = arith.constant dense<0.000000e+00> : vector<16x64xf32>
    %68 = tpu.matmul %65, %67, %cst_39 {dimension_numbers = #tpu.dot_dimension_numbers<[1], [0], [0], [1], [0, 0, 1, 1], [], []>} : vector<16x72xf32>, vector<72x64xf32>, vector<16x64xf32> -> vector<16x64xf32>
    %69 = arith.addf %64, %68 : vector<16x64xf32>
    %c2 = arith.constant 2 : index
    %c0_40 = arith.constant 0 : index
    %70 = vector.load %arg8[%c2, %c0_40] : memref<18x72xf32, #tpu.memory_space<vmem>>, vector<16x72xf32>
    %c2_41 = arith.constant 2 : index
    %c0_42 = arith.constant 0 : index
    %c0_43 = arith.constant 0 : index
    %71 = vector.load %arg5[%c2_41, %c0_42, %c0_43] : memref<3x72x64xf32, #tpu.memory_space<vmem>>, vector<1x72x64xf32>
    %72 = vector.shape_cast %71 : vector<1x72x64xf32> to vector<72x64xf32>
    %cst_44 = arith.constant dense<0.000000e+00> : vector<16x64xf32>
    %73 = tpu.matmul %70, %72, %cst_44 {dimension_numbers = #tpu.dot_dimension_numbers<[1], [0], [0], [1], [0, 0, 1, 1], [], []>} : vector<16x72xf32>, vector<72x64xf32>, vector<16x64xf32> -> vector<16x64xf32>
    %74 = arith.addf %69, %73 : vector<16x64xf32>
    %c0_45 = arith.constant 0 : index
    %c0_46 = arith.constant 0 : index
    %c0_47 = arith.constant 0 : index
    %75 = vector.load %arg6[%c0_45, %c0_46, %c0_47] : memref<1x16x64xf32, #tpu.memory_space<vmem>>, vector<1x16x64xf32>
    %76 = vector.shape_cast %75 : vector<1x16x64xf32> to vector<16x64xf32>
    %77 = vector.shape_cast %74 : vector<16x64xf32> to vector<1x16x64xf32>
    tpu.vector_store %arg6[%c0_45, %c0_46, %c0_47], %77 {strides = array<i32>} : memref<1x16x64xf32, #tpu.memory_space<vmem>>, vector<1x16x64xf32>,
    %78 = tpu.iota {dimensions = array<i32: 0>} : vector<64x4xi32>
    %79 = tpu.iota {dimensions = array<i32: 1>} : vector<64x4xi32>
    %c4_i32_48 = arith.constant 4 : i32
    %c0_i32_49 = arith.constant 0 : i32
    %80 = arith.cmpi eq, %c4_i32_48, %c0_i32_49 : i32
    %c1_i32_50 = arith.constant 1 : i32
    %81 = arith.select %80, %c1_i32_50, %c4_i32_48 : i32
    %82 = vector.broadcast %81 : i32 to vector<64x4xi32>
    %83 = arith.remsi %78, %82 : vector<64x4xi32>
    %c0_i32_51 = arith.constant 0 : i32
    %84 = vector.broadcast %c0_i32_51 : i32 to vector<64x4xi32>
    %85 = arith.cmpi ne, %83, %84 : vector<64x4xi32>
    %c0_i32_52 = arith.constant 0 : i32
    %86 = vector.broadcast %c0_i32_52 : i32 to vector<64x4xi32>
    %87 = arith.cmpi slt, %83, %86 : vector<64x4xi32>
    %c0_i32_53 = arith.constant 0 : i32
    %88 = arith.cmpi slt, %81, %c0_i32_53 : i32
    %89 = vector.broadcast %88 : i1 to vector<64x4xi1>
    %90 = vector.broadcast %89 : vector<64x4xi1> to vector<64x4xi1>
    %91 = arith.xori %87, %90 : vector<64x4xi1>
    %92 = arith.andi %91, %85 : vector<64x4xi1>
    %93 = vector.broadcast %81 : i32 to vector<64x4xi32>
    %94 = arith.addi %83, %93 : vector<64x4xi32>
    %95 = arith.select %92, %94, %83 : vector<64x4xi1>, vector<64x4xi32>
    %96 = arith.cmpi eq, %95, %79 : vector<64x4xi32>
    %97 = arith.extui %96 : vector<64x4xi1> to vector<64x4xi32>
    %98 = arith.sitofp %97 : vector<64x4xi32> to vector<64x4xf32>
    %cst_54 = arith.constant dense<0.000000e+00> : vector<64xf32>
    %99 = vector.multi_reduction <add>, %74, %cst_54 [0] : vector<16x64xf32> to vector<64xf32>
    %100 = vector.shape_cast %99 : vector<64xf32> to vector<1x64xf32>
    %101 = arith.mulf %74, %74 : vector<16x64xf32>
    %cst_55 = arith.constant dense<0.000000e+00> : vector<64xf32>
    %102 = vector.multi_reduction <add>, %101, %cst_55 [0] : vector<16x64xf32> to vector<64xf32>
    %103 = vector.shape_cast %102 : vector<64xf32> to vector<1x64xf32>
    %cst_56 = arith.constant dense<0.000000e+00> : vector<1x4xf32>
    %104 = tpu.matmul %100, %98, %cst_56 {dimension_numbers = #tpu.dot_dimension_numbers<[1], [0], [0], [1], [0, 0, 1, 1], [], []>} : vector<1x64xf32>, vector<64x4xf32>, vector<1x4xf32> -> vector<1x4xf32>
    %c0_57 = arith.constant 0 : index
    %c0_58 = arith.constant 0 : index
    %c0_59 = arith.constant 0 : index
    %105 = vector.load %arg7[%c0_57, %c0_58, %c0_59] : memref<1x2x4xf32, #tpu.memory_space<vmem>>, vector<1x1x4xf32>
    %106 = vector.shape_cast %105 : vector<1x1x4xf32> to vector<1x4xf32>
    %107 = vector.shape_cast %104 : vector<1x4xf32> to vector<1x1x4xf32>
    tpu.vector_store %arg7[%c0_57, %c0_58, %c0_59], %107 {strides = array<i32>} : memref<1x2x4xf32, #tpu.memory_space<vmem>>, vector<1x1x4xf32>,
    %cst_60 = arith.constant dense<0.000000e+00> : vector<1x4xf32>
    %108 = tpu.matmul %103, %98, %cst_60 {dimension_numbers = #tpu.dot_dimension_numbers<[1], [0], [0], [1], [0, 0, 1, 1], [], []>} : vector<1x64xf32>, vector<64x4xf32>, vector<1x4xf32> -> vector<1x4xf32>
    %c0_61 = arith.constant 0 : index
    %c1_62 = arith.constant 1 : index
    %c0_63 = arith.constant 0 : index
    %109 = vector.load %arg7[%c0_61, %c1_62, %c0_63] : memref<1x2x4xf32, #tpu.memory_space<vmem>>, vector<1x1x4xf32>
    %110 = vector.shape_cast %109 : vector<1x1x4xf32> to vector<1x4xf32>
    %111 = vector.shape_cast %108 : vector<1x4xf32> to vector<1x1x4xf32>
    tpu.vector_store %arg7[%c0_61, %c1_62, %c0_63], %111 {strides = array<i32>} : memref<1x2x4xf32, #tpu.memory_space<vmem>>, vector<1x1x4xf32>,
    return
  }
  func.func @transform_0(%arg0: i32) -> (i32, i32, i32) {
    %c0_i32 = arith.constant 0 : i32
    %c0_i32_0 = arith.constant 0 : i32
    %c0_i32_1 = arith.constant 0 : i32
    return %arg0, %c0_i32, %c0_i32_0 : i32, i32, i32
  }
  func.func @transform_1(%arg0: i32) -> (i32, i32, i32) {
    %c0_i32 = arith.constant 0 : i32
    %c0_i32_0 = arith.constant 0 : i32
    %c0_i32_1 = arith.constant 0 : i32
    %c0_i32_2 = arith.constant 0 : i32
    return %c0_i32, %c0_i32_0, %c0_i32_1 : i32, i32, i32
  }
  func.func @transform_2(%arg0: i32) -> (i32, i32) {
    %c0_i32 = arith.constant 0 : i32
    %c0_i32_0 = arith.constant 0 : i32
    %c0_i32_1 = arith.constant 0 : i32
    return %c0_i32, %c0_i32_0 : i32, i32
  }
  func.func @transform_3(%arg0: i32) -> (i32, i32) {
    %c0_i32 = arith.constant 0 : i32
    %c0_i32_0 = arith.constant 0 : i32
    %c0_i32_1 = arith.constant 0 : i32
    return %c0_i32, %c0_i32_0 : i32, i32
  }
  func.func @transform_4(%arg0: i32) -> (i32, i32, i32) {
    %c0_i32 = arith.constant 0 : i32
    %c0_i32_0 = arith.constant 0 : i32
    %c0_i32_1 = arith.constant 0 : i32
    %c0_i32_2 = arith.constant 0 : i32
    return %c0_i32, %c0_i32_0, %c0_i32_1 : i32, i32, i32
  }
  func.func @transform_5(%arg0: i32) -> (i32, i32, i32) {
    %c0_i32 = arith.constant 0 : i32
    %c0_i32_0 = arith.constant 0 : i32
    %c0_i32_1 = arith.constant 0 : i32
    return %arg0, %c0_i32, %c0_i32_0 : i32, i32, i32
  }
  func.func @transform_6(%arg0: i32) -> (i32, i32, i32) {
    %c0_i32 = arith.constant 0 : i32
    %c0_i32_0 = arith.constant 0 : i32
    %c0_i32_1 = arith.constant 0 : i32
    return %arg0, %c0_i32, %c0_i32_0 : i32, i32, i32
  }
}

module attributes {stable_mosaic.version = 11 : i64} {
  func.func @kernel(%arg0: i32, %arg1: memref<1x8x128xf32, #tpu.memory_space<vmem>>, %arg2: memref<2x2x4xf32, #tpu.memory_space<vmem>>, %arg3: memref<1x4xf32, #tpu.memory_space<vmem>>, %arg4: memref<1x4xf32, #tpu.memory_space<vmem>>, %arg5: memref<1x8x128xf32, #tpu.memory_space<vmem>>) attributes {dimension_semantics = [#tpu.dimension_semantics<parallel>], iteration_bounds = array<i64: 2>, scalar_prefetch = 0 : i64, scratch_operands = 0 : i64, tpu.core_type = #tpu.core_type<tc>, window_params = [{transform_indices = @transform_0, window_bounds = array<i64: 1, 8, 128>}, {pipeline_mode = #tpu.pipeline_mode<synchronous>, transform_indices = @transform_1, window_bounds = array<i64: 2, 2, 4>}, {pipeline_mode = #tpu.pipeline_mode<synchronous>, transform_indices = @transform_2, window_bounds = array<i64: 1, 4>}, {pipeline_mode = #tpu.pipeline_mode<synchronous>, transform_indices = @transform_3, window_bounds = array<i64: 1, 4>}, {transform_indices = @transform_4, window_bounds = array<i64: 1, 8, 128>}]} {
    %c0 = arith.constant 0 : index
    %c0_0 = arith.constant 0 : index
    %c0_1 = arith.constant 0 : index
    %0 = vector.load %arg2[%c0, %c0_0, %c0_1] : memref<2x2x4xf32, #tpu.memory_space<vmem>>, vector<2x2x4xf32>
    %c0_2 = arith.constant 0 : index
    %c0_3 = arith.constant 0 : index
    %1 = vector.load %arg3[%c0_2, %c0_3] : memref<1x4xf32, #tpu.memory_space<vmem>>, vector<1x4xf32>
    %c0_4 = arith.constant 0 : index
    %c0_5 = arith.constant 0 : index
    %2 = vector.load %arg4[%c0_4, %c0_5] : memref<1x4xf32, #tpu.memory_space<vmem>>, vector<1x4xf32>
    %cst = arith.constant dense<0.000000e+00> : vector<2x4xf32>
    %3 = vector.multi_reduction <add>, %0, %cst [0] : vector<2x2x4xf32> to vector<2x4xf32>
    %4 = vector.extract_strided_slice %3 {offsets = [0, 0], sizes = [1, 4], strides = [1, 1]} : vector<2x4xf32> to vector<1x4xf32>
    %cst_6 = arith.constant 0.001953125 : f32
    %5 = vector.broadcast %cst_6 : f32 to vector<1x4xf32>
    %6 = arith.mulf %4, %5 : vector<1x4xf32>
    %7 = vector.extract_strided_slice %3 {offsets = [1, 0], sizes = [1, 4], strides = [1, 1]} : vector<2x4xf32> to vector<1x4xf32>
    %cst_7 = arith.constant 0.001953125 : f32
    %8 = vector.broadcast %cst_7 : f32 to vector<1x4xf32>
    %9 = arith.mulf %7, %8 : vector<1x4xf32>
    %10 = arith.mulf %6, %6 : vector<1x4xf32>
    %11 = arith.subf %9, %10 : vector<1x4xf32>
    %cst_8 = arith.constant 9.99999974E-6 : f32
    %12 = vector.broadcast %cst_8 : f32 to vector<1x4xf32>
    %13 = arith.addf %11, %12 : vector<1x4xf32>
    %14 = math.rsqrt %13 : vector<1x4xf32>
    %15 = arith.mulf %1, %14 : vector<1x4xf32>
    %16 = arith.mulf %6, %15 : vector<1x4xf32>
    %17 = arith.subf %2, %16 : vector<1x4xf32>
    %18 = tpu.iota {dimensions = array<i32: 0>} : vector<4x128xi32>
    %19 = tpu.iota {dimensions = array<i32: 1>} : vector<4x128xi32>
    %c4_i32 = arith.constant 4 : i32
    %c0_i32 = arith.constant 0 : i32
    %20 = arith.cmpi eq, %c4_i32, %c0_i32 : i32
    %c1_i32 = arith.constant 1 : i32
    %21 = arith.select %20, %c1_i32, %c4_i32 : i32
    %22 = vector.broadcast %21 : i32 to vector<4x128xi32>
    %23 = arith.remsi %19, %22 : vector<4x128xi32>
    %c0_i32_9 = arith.constant 0 : i32
    %24 = vector.broadcast %c0_i32_9 : i32 to vector<4x128xi32>
    %25 = arith.cmpi ne, %23, %24 : vector<4x128xi32>
    %c0_i32_10 = arith.constant 0 : i32
    %26 = vector.broadcast %c0_i32_10 : i32 to vector<4x128xi32>
    %27 = arith.cmpi slt, %23, %26 : vector<4x128xi32>
    %c0_i32_11 = arith.constant 0 : i32
    %28 = arith.cmpi slt, %21, %c0_i32_11 : i32
    %29 = vector.broadcast %28 : i1 to vector<4x128xi1>
    %30 = vector.broadcast %29 : vector<4x128xi1> to vector<4x128xi1>
    %31 = arith.xori %27, %30 : vector<4x128xi1>
    %32 = arith.andi %31, %25 : vector<4x128xi1>
    %33 = vector.broadcast %21 : i32 to vector<4x128xi32>
    %34 = arith.addi %23, %33 : vector<4x128xi32>
    %35 = arith.select %32, %34, %23 : vector<4x128xi1>, vector<4x128xi32>
    %36 = arith.cmpi eq, %35, %18 : vector<4x128xi32>
    %37 = arith.extui %36 : vector<4x128xi1> to vector<4x128xi32>
    %38 = arith.sitofp %37 : vector<4x128xi32> to vector<4x128xf32>
    %cst_12 = arith.constant dense<0.000000e+00> : vector<1x128xf32>
    %39 = tpu.matmul %15, %38, %cst_12 {dimension_numbers = #tpu.dot_dimension_numbers<[1], [0], [0], [1], [0, 0, 1, 1], [], []>} : vector<1x4xf32>, vector<4x128xf32>, vector<1x128xf32> -> vector<1x128xf32>
    %cst_13 = arith.constant dense<0.000000e+00> : vector<1x128xf32>
    %40 = tpu.matmul %17, %38, %cst_13 {dimension_numbers = #tpu.dot_dimension_numbers<[1], [0], [0], [1], [0, 0, 1, 1], [], []>} : vector<1x4xf32>, vector<4x128xf32>, vector<1x128xf32> -> vector<1x128xf32>
    %c0_14 = arith.constant 0 : index
    %c0_15 = arith.constant 0 : index
    %c0_16 = arith.constant 0 : index
    %41 = vector.load %arg1[%c0_14, %c0_15, %c0_16] : memref<1x8x128xf32, #tpu.memory_space<vmem>>, vector<1x8x128xf32>
    %42 = vector.shape_cast %41 : vector<1x8x128xf32> to vector<8x128xf32>
    %43 = vector.broadcast %39 : vector<1x128xf32> to vector<8x128xf32>
    %44 = arith.mulf %42, %43 : vector<8x128xf32>
    %45 = vector.broadcast %40 : vector<1x128xf32> to vector<8x128xf32>
    %46 = arith.addf %44, %45 : vector<8x128xf32>
    %cst_17 = arith.constant 0.000000e+00 : f32
    %47 = vector.broadcast %cst_17 : f32 to vector<8x128xf32>
    %48 = arith.cmpf oge, %46, %47 : vector<8x128xf32>
    %cst_18 = arith.constant 2.000000e-01 : f32
    %49 = vector.broadcast %cst_18 : f32 to vector<8x128xf32>
    %50 = arith.mulf %49, %46 : vector<8x128xf32>
    %51 = arith.select %48, %46, %50 : vector<8x128xi1>, vector<8x128xf32>
    %c0_19 = arith.constant 0 : index
    %c0_20 = arith.constant 0 : index
    %c0_21 = arith.constant 0 : index
    %52 = vector.load %arg5[%c0_19, %c0_20, %c0_21] : memref<1x8x128xf32, #tpu.memory_space<vmem>>, vector<1x8x128xf32>
    %53 = vector.shape_cast %52 : vector<1x8x128xf32> to vector<8x128xf32>
    %54 = vector.shape_cast %51 : vector<8x128xf32> to vector<1x8x128xf32>
    tpu.vector_store %arg5[%c0_19, %c0_20, %c0_21], %54 {strides = array<i32>} : memref<1x8x128xf32, #tpu.memory_space<vmem>>, vector<1x8x128xf32>,
    return
  }
  func.func @transform_0(%arg0: i32) -> (i32, i32, i32) {
    %c0_i32 = arith.constant 0 : i32
    %c0_i32_0 = arith.constant 0 : i32
    %c0_i32_1 = arith.constant 0 : i32
    return %arg0, %c0_i32, %c0_i32_0 : i32, i32, i32
  }
  func.func @transform_1(%arg0: i32) -> (i32, i32, i32) {
    %c0_i32 = arith.constant 0 : i32
    %c0_i32_0 = arith.constant 0 : i32
    %c0_i32_1 = arith.constant 0 : i32
    %c0_i32_2 = arith.constant 0 : i32
    return %c0_i32, %c0_i32_0, %c0_i32_1 : i32, i32, i32
  }
  func.func @transform_2(%arg0: i32) -> (i32, i32) {
    %c0_i32 = arith.constant 0 : i32
    %c0_i32_0 = arith.constant 0 : i32
    %c0_i32_1 = arith.constant 0 : i32
    return %c0_i32, %c0_i32_0 : i32, i32
  }
  func.func @transform_3(%arg0: i32) -> (i32, i32) {
    %c0_i32 = arith.constant 0 : i32
    %c0_i32_0 = arith.constant 0 : i32
    %c0_i32_1 = arith.constant 0 : i32
    return %c0_i32, %c0_i32_0 : i32, i32
  }
  func.func @transform_4(%arg0: i32) -> (i32, i32, i32) {
    %c0_i32 = arith.constant 0 : i32
    %c0_i32_0 = arith.constant 0 : i32
    %c0_i32_1 = arith.constant 0 : i32
    return %arg0, %c0_i32, %c0_i32_0 : i32, i32, i32
  }
}

</mosaic_0001>

<bundles_post_ra>
// kernel: unet_conv_forward.3
= control target key start
LH: loop header
LB: loop body
LE: loop exit
PB: predicated region body
PF: predicated region fallthrough
CT: control target
= control target key end

     0   :  { %s1171_s12 = smov 0   ;;  %s1401_s0 = inlined_call_operand.vmem [shape: f32[2,16,64], index: 0, kind: input, shape index: {}]   ;;  %s1402_s1 = inlined_call_operand.vmem [shape: f32[3,72,64], index: 1, kind: input, shape index: {}]   ;;  %s1403_s2 = inlined_call_operand.vmem [shape: f32[2,16,64], index: 2, kind: output, shape index: {0}]   ;;  %s1404_s3 = inlined_call_operand.vmem [shape: f32[2,2,4], index: 3, kind: output, shape index: {1}]  }
   0x1 LB: > { %s909_s13 = sadd.s32 4294967295, %s1144_s12   ;;  %p913_p0 = scmp.ge.s32.totalorder %s1144_s12, 1  ;;  %s1144_s12 = sphi %s1171_s12, %s14_s12  }
   0x2   : > { %p140_p1 = scmp.lt.s32.totalorder %s1144_s12, 3 }
   0x4   : > { %p141_p2 = pnand %p913_p0, %p140_p1 }
   0x5   : > { %p168_p3 = scmp.lt.s32.totalorder (!%p141_p2), %s909_s13, 1  ;;  %s1146_s18 = smov (!%p141_p2), 4  }
   0x6   : > { %144 = sbr.rel (%p141_p2) target bundleno = 832 (0x340), region = 28  ;;  %s1147_s23 = smov (!%p141_p2), 124  }
   0xb   : > { %s1422_s13 = smov (!%p168_p3, %s909_s13), 1  ;;  %vm192_vm0 = vcmask 556064   ;;  %vm195_vm1 = vcmask 548896   ;;  %vm197_vm2 = vcmask 556071   ;;  %v927_v5 = vld [vmem:[%s1402_s1 + $0x88] sm:$0xff]  ;;  %v249_v6 = vld [vmem:[%s1402_s1 + $0x40] sm:$0xff]  ;;  %v523_v49 = vlaneseq }
   0xc   : > { %s971_s14 = sshll.u32 %s1422_s13, 4  ;;  %1024 = vmatprep.subr.mxu0 %v927_v5  ;;  %v926_v7 = vld [vmem:[%s1402_s1 + $0x80] sm:$0xff]  ;;  %v248_v8 = vld [vmem:[%s1402_s1 + $0x38] sm:$0xff]  ;;  %1045 = vmatprep.subr.mxu1 %v249_v6  ;;  %v247_v12 = vld [vmem:[%s1402_s1 + $0x30] sm:$0xff]  ;;  %vm214_vm3 = vcmask 31744   ;;  %vm217_vm4 = vcmask 25600  }
   0xd   : > { %s172_s17 = scalar_lea.vmem %s1401_s0, %s971_s14  ;;  %1025 = vmatpush3.msra.mxu0 %v927_v5  ;;  %1046 = vmatpush3.msra.mxu1 %v249_v6  ;;  %v925_v9 = vld [vmem:[%s1402_s1 + $0x78] sm:$0xff]  ;;  %v924_v13 = vld [vmem:[%s1402_s1 + $0x70] sm:$0xff]  ;;  %v246_v14 = vld [vmem:[%s1402_s1 + $0x28] sm:$0xff]  ;;  %vm234_vm5 = vcmask 589344   ;;  %vm237_vm6 = vcmask 583200   ;;  %vm262_vm7 = vcmask 588800   ;;  %s177_s29 = scalar_lea.vmem %s1403_s2, %s971_s14 }
   0xe   : > { %v182_v0 = vld [vmem:[%s172_s17] sm:$0xff]  ;;  %v183_v1 = vld [vmem:[%s172_s17 + $0x8] sm:$0xff]  ;;  %1026 = vmatprep.subr.mxu0 %v926_v7  ;;  %1047 = vmatprep.subr.mxu1 %v248_v8  ;;  %v244_v18 = vld [vmem:[%s1402_s1 + $0x18] sm:$0xff]  ;;  %v524_v50 = vshrl.u32 %v523_v49, 7  ;;  %v533_v52 = vand.u32 127, %v523_v49  ;;  %v1148_v55 = vmov 0.0  }
   0xf   : > { %186 = vrot.lane.b32.xlu0 %v182_v0, %s1146_s18  ;;  %1027 = vmatpush3.msra.mxu0 %v926_v7  ;;  %v923_v15 = vld [vmem:[%s1402_s1 + $0x68] sm:$0xff]  ;;  %v245_v16 = vld [vmem:[%s1402_s1 + $0x20] sm:$0xff]  ;;  %v921_v20 = vld [vmem:[%s1402_s1 + $0x58] sm:$0xff]  ;;  %v1149_v59 = vmov 1.0   ;;  %s918_s14 = sshll.u32 %s1422_s13, 1 }
  0x10   : > { %1048 = vmatpush3.msra.mxu1 %v248_v8  ;;  %1028 = vmatprep.subr.mxu0 %v925_v9  ;;  %v922_v17 = vld [vmem:[%s1402_s1 + $0x60] sm:$0xff]  ;;  %v243_v21 = vld [vmem:[%s1402_s1 + $0x10] sm:$0xff]  ;;  %v242_v23 = vld [vmem:[%s1402_s1 + $0x8] sm:$0xff]  ;;  %v531_v51 = vadd.s32 56, %v524_v50  ;;  %v530_v54 = vadd.s32 48, %v524_v50  ;;  %v529_v58 = vadd.s32 40, %v524_v50  ;;  %s181_s5 = scalar_lea.vmem %s1404_s3, %s918_s14 }
  0x11   : > { %1049 = vmatprep.subr.mxu1 %v247_v12  ;;  %1029 = vmatpush3.msra.mxu0 %v925_v9  ;;  %v920_v22 = vld [vmem:[%s1402_s1 + $0x50] sm:$0xff]  ;;  %v919_v26 = vld [vmem:[%s1402_s1 + $0x48] sm:$0xff]  ;;  %v241_v27 = vld [vmem:[%s1402_s1] sm:$0xff]  ;;  %v528_v62 = vadd.s32 32, %v524_v50  ;;  %v525_v7 = vadd.s32 8, %v524_v50 }
  0x12   : > { %1050 = vmatpush3.msra.mxu1 %v247_v12  ;;  %1030 = vmatprep.subr.mxu0 %v924_v13  ;;  %v940_v28 = vld [vmem:[%s1402_s1 + $0xd0] sm:$0xff]  ;;  %v939_v39 = vld [vmem:[%s1402_s1 + $0xc8] sm:$0xff]  ;;  %v938_v41 = vld [vmem:[%s1402_s1 + $0xc0] sm:$0xff]  ;;  %v587_v53 = vand.u32 3, %v531_v51  ;;  %v580_v57 = vand.u32 3, %v530_v54  ;;  %v573_v61 = vand.u32 3, %v529_v58 }
  0x13   : > { %188 = vrot.lane.b32.xlu0 %v183_v1, %s1146_s18  ;;  %1051 = vmatprep.subr.mxu1 %v246_v14  ;;  %v937_v42 = vld [vmem:[%s1402_s1 + $0xb8] sm:$0xff]  ;;  %v936_v43 = vld [vmem:[%s1402_s1 + $0xb0] sm:$0xff]  ;;  %v935_v44 = vld [vmem:[%s1402_s1 + $0xa8] sm:$0xff]  ;;  %v566_v0 = vand.u32 3, %v528_v62  ;;  %v527_v1 = vadd.s32 24, %v524_v50  ;;  %v545_v9 = vand.u32 3, %v525_v7 }
  0x14   : > { %1031 = vmatpush3.msra.mxu0 %v924_v13  ;;  %1052 = vmatpush3.msra.mxu1 %v246_v14  ;;  %v934_v45 = vld [vmem:[%s1402_s1 + $0xa0] sm:$0xff]  ;;  %v933_v46 = vld [vmem:[%s1402_s1 + $0x98] sm:$0xff]  ;;  %v932_v47 = vld [vmem:[%s1402_s1 + $0x90] sm:$0xff]  ;;  %vm1282_vm8 = vcmp.eq.s32.totalorder %v587_v53, %v533_v52  ;;  %vm1290_vm9 = vcmp.eq.s32.totalorder %v580_v57, %v533_v52  ;;  %vm1298_vm10 = vcmp.eq.s32.totalorder %v573_v61, %v533_v52 }
  0x15   : > { %1032 = vmatprep.subr.mxu0 %v923_v15  ;;  %1053 = vmatprep.subr.mxu1 %v245_v16  ;;  %vm1306_vm11 = vcmp.eq.s32.totalorder %v566_v0, %v533_v52  ;;  %vm1330_vm14 = vcmp.eq.s32.totalorder %v545_v9, %v533_v52 }
  0x16   : > { %1033 = vmatpush3.msra.mxu0 %v923_v15  ;;  %1054 = vmatpush3.msra.mxu1 %v245_v16 }
  0x17   : > { %1034 = vmatprep.subr.mxu0 %v922_v17  ;;  %1055 = vmatprep.subr.mxu1 %v244_v18 }
  0x18   : > { %1035 = vmatpush3.msra.mxu0 %v922_v17  ;;  %1056 = vmatpush3.msra.mxu1 %v244_v18 }
  0x19   : > { %1036 = vmatprep.subr.mxu0 %v921_v20  ;;  %1057 = vmatprep.subr.mxu1 %v243_v21 }
  0x1a   : > { %1037 = vmatpush3.msra.mxu0 %v921_v20  ;;  %1058 = vmatpush3.msra.mxu1 %v243_v21 }
  0x1b   : > { %1038 = vmatprep.subr.mxu0 %v920_v22  ;;  %1059 = vmatprep.subr.mxu1 %v242_v23 }
  0x1c   : > { %1039 = vmatpush3.msra.mxu0 %v920_v22  ;;  %1060 = vmatpush3.msra.mxu1 %v242_v23 }
  0x1d   : > { %1040 = vmatprep.subr.mxu0 %v919_v26  ;;  %1061 = vmatprep.subr.mxu1 %v241_v27 }
  0x1e   : > { %1041 = vmatpush3.msra.mxu0 %v919_v26  ;;  %1062 = vmatpush3.msra.mxu1 %v241_v27 }
  0x1f   : > { %1066 = vmatprep.subr.mxu0 %v940_v28  ;;  %1087 = vmatprep.subr.mxu1 %v1148_v55 }
  0x81   : > { %v187_v2 = vpop.permute.xlu0 %186 }
  0x82   : > { %193 = vst.msk [vmem:[#allocation2 + $0x1] sm:$0xff] %vm192_vm0, %v187_v2 }
  0x83   : > { %196 = vst.msk [vmem:[#allocation2] sm:$0x1] %vm195_vm1, %v187_v2  ;;  %vm520_vm1 = vcmask 523264  }
  0x85   : > { %v189_v3 = vpop.permute.xlu0 %188 }
  0x86   : > { %194 = vst.msk [vmem:[#allocation2 + $0x9] sm:$0xff] %vm192_vm0, %v189_v3  ;;  %vm1150_vm0 = vmmov 0  }
  0x87   : > { %198 = vst.msk [vmem:[#allocation2 + $0xa] sm:$0x80] %vm197_vm2, %v189_v3  ;;  %v559_v3 = vand.u32 3, %v527_v1  ;;  %vm747_vm2 = vcmask 24576  }
  0x89   : > { %vm1314_vm12 = vcmp.eq.s32.totalorder %v559_v3, %v533_v52 }
  0x8a   : > { %v199_v4 = vld [vmem:[#allocation2] sm:$0xff] }
  0x8b   : > { %205 = vrot.lane.b32.xlu1 %v199_v4, %s1147_s23  ;;  %v526_v4 = vadd.s32 16, %v524_v50 }
  0x8d   : > { %v200_v11 = vld [vmem:[#allocation2 + $0x8] sm:$0xff]  ;;  %v552_v6 = vand.u32 3, %v526_v4 }
  0x8e   : > { %v201_v10 = vld [vmem:[#allocation2 + $0x10] sm:$0x3] }
  0x8f   : > { %209 = vrot.lane.b32.xlu0 %v201_v10, %s1147_s23  ;;  %207 = vrot.lane.b32.xlu1 %v200_v11, %s1147_s23  ;;  %vm1322_vm13 = vcmp.eq.s32.totalorder %v552_v6, %v533_v52  ;;  %v538_v11 = vand.u32 3, %v524_v50 }
  0x91   : > { %vm1338_vm15 = vcmp.eq.s32.totalorder %v538_v11, %v533_v52 }
  0xfd   : > { %v206_v19 = vpop.permute.xlu1 %205 }
  0xfe   : > { %215 = vst.msk [vmem:[#allocation2] sm:$0xff] %vm214_vm3, %v206_v19 }
 0x101   : > { %v210_v24 = vpop.permute.xlu0 %209  ;;  %v208_v25 = vpop.permute.xlu1 %207 }
 0x102   : > { %218 = vst.msk [vmem:[#allocation2 + $0x10] sm:$0x3] %vm217_vm4, %v210_v24 }
 0x103   : > { %216 = vst.msk [vmem:[#allocation2 + $0x8] sm:$0xff] %vm214_vm3, %v208_v25 }
 0x105   : > { %v219_v29 = vld [vmem:[#allocation2] sm:$0xff] }
 0x106   : > { %225 = vrot.lane.b32.xlu1 %v219_v29, %s1146_s18 }
 0x109   : > { %v221_v30 = vld [vmem:[#allocation2 + $0x10] sm:$0x3] }
 0x10a   : > { %v220_v31 = vld [vmem:[#allocation2 + $0x8] sm:$0xff]  ;;  %229 = vrot.lane.b32.xlu1 %v221_v30, %s1146_s18 }
 0x10b   : > { %227 = vrot.lane.b32.xlu0 %v220_v31, %s1146_s18 }
 0x178   : > { %v226_v32 = vpop.permute.xlu1 %225 }
 0x179   : > { %235 = vst.msk [vmem:[#allocation2] sm:$0xff] %vm234_vm5, %v226_v32 }
 0x17c   : > { %v230_v34 = vpop.permute.xlu1 %229 }
 0x17d   : > { %v228_v33 = vpop.permute.xlu0 %227  ;;  %238 = vst.msk [vmem:[#allocation2 + $0x10] sm:$0x3] %vm237_vm6, %v230_v34 }
 0x17e   : > { %236 = vst.msk [vmem:[#allocation2 + $0x8] sm:$0xff] %vm234_vm5, %v228_v33 }
 0x180   : > { %v239_v35 = vld [vmem:[#allocation2] sm:$0xff] }
 0x181   : > { %1063 = vmatprep.mubr.msk.f32.mxu1 %vm262_vm7, %v239_v35 }
 0x185   : > { %v250_v36 = vld [vmem:[#allocation2 + $0x1] sm:$0xff]  ;;  %v251_v38 = vld [vmem:[#allocation2 + $0x9] sm:$0xff] }
 0x186   : > { %v240_v37 = vld [vmem:[#allocation2 + $0x8] sm:$0xff]  ;;  %1042 = vmatprep.mubr.msk.f32.mxu0 %vm262_vm7, %v250_v36 }
 0x187   : > { %1064 = vmatmul.mubr.msk.f32.vlgmr.msra.gmra.mxu1 %vm262_vm7, %v240_v37  ;;  %1043 = vmatmul.mubr.msk.f32.vlgmr.msra.gmra.mxu0 %vm262_vm7, %v251_v38  ;;  %v425_v40 = vld [vmem:[#allocation2 + $0x2] sm:$0xff]  ;;  %v426_v48 = vld [vmem:[#allocation2 + $0xa] sm:$0xff] }
 0x188   : > { %1067 = vmatpush3.msra.mxu0 %v940_v28  ;;  %1084 = vmatprep.mubr.msk.f32.mxu0 %vm262_vm7, %v425_v40 }
 0x189   : > { %1068 = vmatprep.subr.mxu0 %v939_v39  ;;  %1088 = vmatpush3.msk.msra.mxu1 %vm1282_vm8, %v1149_v59 }
 0x18a   : > { %1069 = vmatpush3.msra.mxu0 %v939_v39  ;;  %1089 = vmatprep.subr.mxu1 %v1148_v55 }
 0x18b   : > { %1070 = vmatprep.subr.mxu0 %v938_v41  ;;  %1090 = vmatpush3.msk.msra.mxu1 %vm1290_vm9, %v1149_v59 }
 0x18c   : > { %1071 = vmatpush3.msra.mxu0 %v938_v41  ;;  %1091 = vmatprep.subr.mxu1 %v1148_v55 }
 0x18d   : > { %1072 = vmatprep.subr.mxu0 %v937_v42  ;;  %1092 = vmatpush3.msk.msra.mxu1 %vm1298_vm10, %v1149_v59 }
 0x18e   : > { %1073 = vmatpush3.msra.mxu0 %v937_v42  ;;  %1093 = vmatprep.subr.mxu1 %v1148_v55 }
 0x18f   : > { %1074 = vmatprep.subr.mxu0 %v936_v43  ;;  %1094 = vmatpush3.msk.msra.mxu1 %vm1306_vm11, %v1149_v59 }
 0x190   : > { %1075 = vmatpush3.msra.mxu0 %v936_v43  ;;  %1095 = vmatprep.subr.mxu1 %v1148_v55 }
 0x191   : > { %1076 = vmatprep.subr.mxu0 %v935_v44  ;;  %1096 = vmatpush3.msk.msra.mxu1 %vm1314_vm12, %v1149_v59 }
 0x192   : > { %1077 = vmatpush3.msra.mxu0 %v935_v44  ;;  %1097 = vmatprep.subr.mxu1 %v1148_v55 }
 0x193   : > { %1078 = vmatprep.subr.mxu0 %v934_v45  ;;  %1098 = vmatpush3.msk.msra.mxu1 %vm1322_vm13, %v1149_v59 }
 0x194   : > { %1079 = vmatpush3.msra.mxu0 %v934_v45  ;;  %1099 = vmatprep.subr.mxu1 %v1148_v55 }
 0x195   : > { %1080 = vmatprep.subr.mxu0 %v933_v46  ;;  %1100 = vmatpush3.msk.msra.mxu1 %vm1330_vm14, %v1149_v59 }
 0x196   : > { %1081 = vmatpush3.msra.mxu0 %v933_v46  ;;  %1101 = vmatprep.subr.mxu1 %v1148_v55 }
 0x197   : > { %1082 = vmatprep.subr.mxu0 %v932_v47  ;;  %1103 = vmatprep.mubr.msk.f32.mxu1 %vm1150_vm0, %v1148_v55 }
 0x198   : > { %1083 = vmatpush3.msra.mxu0 %v932_v47  ;;  %1102 = vmatpush3.msk.msra.mxu1 %vm1338_vm15, %v1149_v59 }
 0x199   : > { %1085 = vmatmul.mubr.msk.f32.vlgmr.msra.gmra.mxu0 %vm262_vm7, %v426_v48  ;;  %1106 = vmatprep.subr.mxu1 %v1148_v55 }
 0x247   : > { %v1065_v13 = vpop.f32.mrf.mxu1  ;;  %v1044_v14 = vpop.f32.mrf.mxu0 }
 0x248   : > { %v422_v17 = vadd.f32 %v1065_v13, %v1044_v14 }
 0x249   : > { %v416_v15 = vpop.f32.mrf.mxu1  ;;  %v335_v16 = vpop.f32.mrf.mxu0 }
 0x24a   : > { %v417_v19 = vadd.f32 %v416_v15, %v335_v16 }
 0x259   : > { %v1086_v18 = vpop.f32.mrf.mxu0 }
 0x25a   : > { %v519_v20 = vadd.f32 %v1086_v18, %v422_v17 }
 0x25b   : > { %v509_v21 = vpop.f32.mrf.mxu0 }
 0x25c   : > { %522 = vst.msk [vmem:[%s177_s29 + $0x8] sm:$0xff] %vm520_vm1, %v519_v20  ;;  %v518_v22 = vadd.f32 %v509_v21, %v417_v19  ;;  %v655_v23 = vsel %vm520_vm1, %v519_v20, 0.0  ;;  %v664_v24 = vmul.f32 %v519_v20, %v519_v20 }
 0x25e   : > { %521 = vst.msk [vmem:[%s177_s29] sm:$0xff] %vm520_vm1, %v518_v22  ;;  %v654_v25 = vsel %vm520_vm1, %v518_v22, 0.0  ;;  %v663_v26 = vmul.f32 %v518_v22, %v518_v22  ;;  %v666_v30 = vsel %vm520_vm1, %v664_v24, 0.0 }
 0x25f   : > { %v656_v27 = vadd.f32 %v655_v23, %v654_v25 }
 0x260   : > { %v665_v28 = vsel %vm520_vm1, %v663_v26, 0.0 }
 0x261   : > { %v657_v29 = vrot.slane %v656_v27, 4  ;;  %v667_v32 = vadd.f32 %v666_v30, %v665_v28 }
 0x263   : > { %v658_v31 = vadd.f32 %v657_v29, %v656_v27  ;;  %v668_v35 = vrot.slane %v667_v32, 4 }
 0x265   : > { %v659_v33 = vrot.slane %v658_v31, 2  ;;  %v669_v37 = vadd.f32 %v668_v35, %v667_v32 }
 0x267   : > { %v660_v34 = vadd.f32 %v659_v33, %v658_v31  ;;  %v670_v39 = vrot.slane %v669_v37, 2 }
 0x269   : > { %v661_v36 = vrot.slane %v660_v34, 1  ;;  %v671_v40 = vadd.f32 %v670_v39, %v669_v37 }
 0x26b   : > { %v662_v38 = vadd.f32 %v661_v36, %v660_v34  ;;  %v672_v41 = vrot.slane %v671_v40, 1 }
 0x26d   : > { %1104 = vmatmul.mubr.msk.f32.vlgmr.msra.gmra.mxu1 %vm520_vm1, %v662_v38  ;;  %v673_v42 = vadd.f32 %v672_v41, %v671_v40 }
 0x26e   : > { %1107 = vmatpush3.msk.msra.mxu1 %vm1282_vm8, %v1149_v59  ;;  %1122 = vmatprep.mubr.msk.f32.mxu1 %vm1150_vm0, %v1148_v55 }
 0x26f   : > { %1108 = vmatprep.subr.mxu1 %v1148_v55 }
 0x270   : > { %1109 = vmatpush3.msk.msra.mxu1 %vm1290_vm9, %v1149_v59 }
 0x271   : > { %1110 = vmatprep.subr.mxu1 %v1148_v55 }
 0x272   : > { %1111 = vmatpush3.msk.msra.mxu1 %vm1298_vm10, %v1149_v59 }
 0x273   : > { %1112 = vmatprep.subr.mxu1 %v1148_v55 }
 0x274   : > { %1113 = vmatpush3.msk.msra.mxu1 %vm1306_vm11, %v1149_v59 }
 0x275   : > { %1114 = vmatprep.subr.mxu1 %v1148_v55 }
 0x276   : > { %1115 = vmatpush3.msk.msra.mxu1 %vm1314_vm12, %v1149_v59 }
 0x277   : > { %1116 = vmatprep.subr.mxu1 %v1148_v55 }
 0x278   : > { %1117 = vmatpush3.msk.msra.mxu1 %vm1322_vm13, %v1149_v59 }
 0x279   : > { %1118 = vmatprep.subr.mxu1 %v1148_v55 }
 0x27a   : > { %1119 = vmatpush3.msk.msra.mxu1 %vm1330_vm14, %v1149_v59 }
 0x27b   : > { %1120 = vmatprep.subr.mxu1 %v1148_v55 }
 0x27c   : > { %1121 = vmatpush3.msk.msra.mxu1 %vm1338_vm15, %v1149_v59 }
 0x27d   : > { %1123 = vmatmul.mubr.msk.f32.vlgmr.msra.gmra.mxu1 %vm520_vm1, %v673_v42 }
 0x32d   : > { %v743_v43 = vpop.f32.mrf.mxu1 }
 0x32e   : > { %748 = vst.msk [vmem:[%s181_s5] sm:$0x1] %vm747_vm2, %v743_v43 }
 0x32f   : > { %v1105_v44 = vpop.f32.mrf.mxu1 }
 0x33d   : > { %v818_v45 = vpop.f32.mrf.mxu1 }
 0x33e   : > { %822 = vst.msk [vmem:[%s181_s5 + $0x1] sm:$0x1] %vm747_vm2, %v818_v45 }
 0x33f   : > { %v1124_v46 = vpop.f32.mrf.mxu1 }
 0x340 PF: > { %s14_s12 = sadd.s32 1, %s1144_s12  }
 0x341   : > { %p11_p4 = scmp.ge.s32.totalorder %s14_s12, 4  }
 0x343   :  { %13 = sbr.rel (!%p11_p4) target bundleno = 1 (0x1), region = 72 }

// kernel: unet_conv_forward.4
= control target key start
LH: loop header
LB: loop body
LE: loop exit
PB: predicated region body
PF: predicated region fallthrough
CT: control target
= control target key end

     0   :  { %s1508_s21 = smov 0   ;;  %s1792_s0 = inlined_call_operand.vmem [shape: f32[2,16,64], index: 0, kind: input, shape index: {}]   ;;  %s1793_s1 = inlined_call_operand.vmem [shape: f32[2,2,4], index: 1, kind: input, shape index: {}]   ;;  %s1794_s2 = inlined_call_operand.vmem [shape: f32[1,4], index: 2, kind: input, shape index: {}]   ;;  %s1795_s3 = inlined_call_operand.vmem [shape: f32[1,4], index: 3, kind: input, shape index: {}]   ;;  %s1796_s4 = inlined_call_operand.vmem [shape: f32[3,72,64], index: 4, kind: input, shape index: {}]   ;;  %s1797_s5 = inlined_call_operand.vmem [shape: f32[2,16,64], index: 5, kind: output, shape index: {0}]   ;;  %s1798_s6 = inlined_call_operand.vmem [shape: f32[2,2,4], index: 6, kind: output, shape index: {1}]  }
   0x1 LB: > { %s1208_s22 = sadd.s32 4294967295, %s1465_s21   ;;  %p1212_p0 = scmp.ge.s32.totalorder %s1465_s21, 1  ;;  %s1465_s21 = sphi %s1508_s21, %s17_s21  }
   0x2   : > { %p215_p1 = scmp.lt.s32.totalorder %s1465_s21, 3 }
   0x4   : > { %p216_p2 = pnand %p1212_p0, %p215_p1 }
   0x5   : > { %p249_p3 = scmp.lt.s32.totalorder (!%p216_p2), %s1208_s22, 1  ;;  %s1470_s11 = smov (!%p216_p2), 4  }
   0x6   : > { %219 = sbr.rel (%p216_p2) target bundleno = 1069 (0x42d), region = 40  ;;  %s1471_s16 = smov (!%p216_p2), 124  }
   0xb   : > { %v283_v0 = vlaneseq  ;;  %v263_v1 = vld [vmem:[%s1793_s1] sm:$0x3]  ;;  %v1467_v2 = vmov 0.0   ;;  %vm1468_vm0 = vmmov 0   ;;  %v264_v3 = vld [vmem:[%s1793_s1 + $0x2] sm:$0x3] }
   0xc   : > { %1332 = vmatprep.subr.mxu0 %v1467_v2  ;;  %1334 = vmatprep.mubr.msk.f32.mxu0 %vm1468_vm0, %v1467_v2  ;;  %vm267_vm1 = vcmask 25600   ;;  %vm322_vm2 = vcmask 1043456   ;;  %v1469_v16 = vmov 1966171168   ;;  %v265_v23 = vld [vmem:[%s1794_s2] sm:$0x1] }
   0xd   : > { %v1525_v4 = vand.u32 127, %v283_v0  ;;  %v268_v5 = vsel %vm267_vm1, %v263_v1, 0.0  ;;  %v269_v6 = vsel %vm267_vm1, %v264_v3, 0.0  ;;  %v1529_v7 = vshrl.u32 %v283_v0, 7  ;;  %v266_v26 = vld [vmem:[%s1795_s3] sm:$0x1] }
   0xe   : > { %v270_v9 = vadd.f32 %v269_v6, %v268_v5  ;;  %v281_v17 = vunpack.c.l.s4 %v1469_v16  ;;  %vm318_vm4 = vcmask 31744   ;;  %s1816_s22 = smov (!%p249_p3, %s1208_s22), 1  ;;  %vm497_vm7 = vcmask 556064   ;;  %v1231_v49 = vld [vmem:[%s1796_s4 + $0x88] sm:$0xff]  ;;  %v552_v50 = vld [vmem:[%s1796_s4 + $0x40] sm:$0xff]  ;;  %v551_v52 = vld [vmem:[%s1796_s4 + $0x38] sm:$0xff] }
   0xf   : > { %v307_v8 = vand.u32 3, %v1525_v4  ;;  %s1275_s7 = sshll.u32 %s1816_s22, 4  ;;  %v473_v29 = vsub.s32 0, %v1529_v7  ;;  %vm500_vm8 = vcmask 548896   ;;  %vm502_vm9 = vcmask 556071   ;;  %v1230_v51 = vld [vmem:[%s1796_s4 + $0x80] sm:$0xff]  ;;  %1363 = vmatprep.subr.mxu1 %v552_v50 }
  0x10   : > { %v271_v10 = vmul.f32 0.001953125, %v270_v9  ;;  %v282_v18 = vunpack.c.0.s8 %v281_v17  ;;  %s253_s10 = scalar_lea.vmem %s1792_s0, %s1275_s7  ;;  %1364 = vmatpush3.msra.mxu1 %v552_v50  ;;  %v1229_v53 = vld [vmem:[%s1796_s4 + $0x78] sm:$0xff]  ;;  %v550_v56 = vld [vmem:[%s1796_s4 + $0x30] sm:$0xff]  ;;  %v549_v58 = vld [vmem:[%s1796_s4 + $0x28] sm:$0xff]  ;;  %vm537_vm10 = vcmask 589344   ;;  %vm540_vm11 = vcmask 583200   ;;  %s258_s30 = scalar_lea.vmem %s1797_s5, %s1275_s7 }
  0x11   : > { %vm315_vm3 = vcmp.eq.s32.totalorder %v307_v8, %v1529_v7  ;;  %v469_v32 = vld [vmem:[%s253_s10] sm:$0xff]  ;;  %v470_v33 = vld [vmem:[%s253_s10 + $0x8] sm:$0xff]  ;;  %1365 = vmatprep.subr.mxu1 %v551_v52  ;;  %v1228_v57 = vld [vmem:[%s1796_s4 + $0x70] sm:$0xff]  ;;  %vm565_vm12 = vcmask 588800   ;;  %v826_v50 = vadd.s32 8, %v1529_v7  ;;  %s1217_s7 = sshll.u32 %s1816_s22, 1 }
  0x12   : > { %v1218_v11 = vsel %vm315_vm3, 1.0, %v1467_v2  ;;  %v272_v12 = vmul.f32 %v271_v10, %v271_v10  ;;  %v285_v19 = vsub.s32 %v282_v18, %v1529_v7  ;;  %1366 = vmatpush3.msra.mxu1 %v551_v52  ;;  %v1227_v59 = vld [vmem:[%s1796_s4 + $0x68] sm:$0xff]  ;;  %v548_v60 = vld [vmem:[%s1796_s4 + $0x20] sm:$0xff]  ;;  %v547_v62 = vld [vmem:[%s1796_s4 + $0x18] sm:$0xff] }
  0x13   : > { %1333 = vmatpush3.msk.msra.mxu0 %vm322_vm2, %v1218_v11  ;;  %1367 = vmatprep.subr.mxu1 %v550_v56  ;;  %v1226_v61 = vld [vmem:[%s1796_s4 + $0x60] sm:$0xff]  ;;  %v1225_v0 = vld [vmem:[%s1796_s4 + $0x58] sm:$0xff]  ;;  %v546_v1 = vld [vmem:[%s1796_s4 + $0x10] sm:$0xff]  ;;  %v844_v52 = vand.u32 3, %v826_v50 }
  0x14   : > { %1337 = vmatprep.subr.mxu0 %v1467_v2  ;;  %v274_v13 = vrot.slane %v272_v12, 7  ;;  %1368 = vmatpush3.msra.mxu1 %v550_v56  ;;  %v1224_v3 = vld [vmem:[%s1796_s4 + $0x50] sm:$0xff]  ;;  %v545_v5 = vld [vmem:[%s1796_s4 + $0x8] sm:$0xff] }
  0x15   : > { %1369 = vmatprep.subr.mxu1 %v549_v58  ;;  %v1223_v9 = vld [vmem:[%s1796_s4 + $0x48] sm:$0xff] }
  0x16   : > { %v276_v14 = vsub.f32 %v271_v10, %v274_v13  ;;  %1370 = vmatpush3.msra.mxu1 %v549_v58 }
  0x17   : > { %1371 = vmatprep.subr.mxu1 %v548_v60 }
  0x18   : > { %v277_v15 = vadd.f32 1e-05, %v276_v14  ;;  %1372 = vmatpush3.msra.mxu1 %v548_v60 }
  0x19   : > { %1373 = vmatprep.subr.mxu1 %v547_v62 }
  0x1a   : > { %1457 = vrsqrt.f32 %v277_v15  ;;  %1374 = vmatpush3.msra.mxu1 %v547_v62 }
  0x1b   : > { %1375 = vmatprep.subr.mxu1 %v546_v1 }
  0x1c   : > { %1376 = vmatpush3.msra.mxu1 %v546_v1 }
  0x1d   : > { %1377 = vmatprep.subr.mxu1 %v545_v5 }
  0x1e   : > { %1378 = vmatpush3.msra.mxu1 %v545_v5 }
  0x27   : > { %v1458_v20 = vpop.eup %1457 }
  0x28   : > { %v286_v21 = vrot.slane %v1458_v20, %v285_v19 }
  0x2a   : > { %v287_v22 = vcombine.high %v286_v21, %v286_v21 }
  0x2c   : > { %v294_v24 = vrot.slane %v287_v22, %v285_v19  ;;  %v1243_v22 = vld [vmem:[%s1796_s4 + $0xc8] sm:$0xff] }
  0x2e   : > { %v296_v25 = vmul.f32 %v294_v24, %v265_v23  ;;  %v1242_v24 = vld [vmem:[%s1796_s4 + $0xc0] sm:$0xff] }
  0x30   : > { %v297_v27 = vmul.f32 %v296_v25, %v271_v10  ;;  %1335 = vmatmul.mubr.msk.f32.vlgmr.msra.gmra.mxu0 %vm318_vm4, %v296_v25  ;;  %v544_v10 = vld [vmem:[%s1796_s4] sm:$0xff]  ;;  %v1241_v25 = vld [vmem:[%s1796_s4 + $0xb8] sm:$0xff] }
  0x31   : > { %1338 = vmatpush3.msk.msra.mxu0 %vm322_vm2, %v1218_v11  ;;  %1339 = vmatprep.mubr.msk.f32.mxu0 %vm1468_vm0, %v1467_v2  ;;  %v1244_v11 = vld [vmem:[%s1796_s4 + $0xd0] sm:$0xff] }
  0x32   : > { %v298_v28 = vsub.f32 %v266_v26, %v297_v27  ;;  %1342 = vmatprep.subr.mxu0 %v1231_v49  ;;  %1379 = vmatprep.subr.mxu1 %v544_v10  ;;  %v1240_v26 = vld [vmem:[%s1796_s4 + $0xb0] sm:$0xff]  ;;  %v1239_v27 = vld [vmem:[%s1796_s4 + $0xa8] sm:$0xff] }
  0x33   : > { %1380 = vmatpush3.msra.mxu1 %v544_v10 }
  0x34   : > { %1340 = vmatmul.mubr.msk.f32.vlgmr.msra.gmra.mxu0 %vm318_vm4, %v298_v28  ;;  %1405 = vmatprep.subr.mxu1 %v1467_v2  ;;  %v1238_v28 = vld [vmem:[%s1796_s4 + $0xa0] sm:$0xff] }
  0x35   : > { %1343 = vmatpush3.msra.mxu0 %v1231_v49 }
  0x36   : > { %1344 = vmatprep.subr.mxu0 %v1230_v51 }
  0x37   : > { %1345 = vmatpush3.msra.mxu0 %v1230_v51 }
  0x38   : > { %1346 = vmatprep.subr.mxu0 %v1229_v53 }
  0x39   : > { %1347 = vmatpush3.msra.mxu0 %v1229_v53 }
  0x3a   : > { %1348 = vmatprep.subr.mxu0 %v1228_v57 }
  0x3b   : > { %1349 = vmatpush3.msra.mxu0 %v1228_v57 }
  0x3c   : > { %1350 = vmatprep.subr.mxu0 %v1227_v59 }
  0x3d   : > { %1351 = vmatpush3.msra.mxu0 %v1227_v59 }
  0x3e   : > { %1352 = vmatprep.subr.mxu0 %v1226_v61 }
  0x3f   : > { %1353 = vmatpush3.msra.mxu0 %v1226_v61 }
  0x40   : > { %1354 = vmatprep.subr.mxu0 %v1225_v0 }
  0x41   : > { %1355 = vmatpush3.msra.mxu0 %v1225_v0 }
  0x42   : > { %1356 = vmatprep.subr.mxu0 %v1224_v3 }
  0x43   : > { %1357 = vmatpush3.msra.mxu0 %v1224_v3 }
  0x44   : > { %1358 = vmatprep.subr.mxu0 %v1223_v9 }
  0x45   : > { %1359 = vmatpush3.msra.mxu0 %v1223_v9 }
  0x46   : > { %1384 = vmatprep.subr.mxu0 %v1244_v11 }
  0xf0   : > { %v392_v30 = vpop.f32.mrf.mxu0 }
  0xf1   : > { %v474_v31 = vrot.slane %v392_v30, %v473_v29  ;;  %v1236_v30 = vld [vmem:[%s1796_s4 + $0x90] sm:$0xff] }
  0xf2   : > { %v1336_v34 = vpop.f32.mrf.mxu0 }
  0xf3   : > { %v475_v36 = vmul.f32 %v474_v31, %v469_v32  ;;  %v476_v37 = vmul.f32 %v474_v31, %v470_v33  ;;  %v832_v32 = vadd.s32 56, %v1529_v7  ;;  %v831_v34 = vadd.s32 48, %v1529_v7 }
  0xf4   : > { %v465_v35 = vpop.f32.mrf.mxu0 }
  0xf5   : > { %v480_v38 = vrot.slane %v465_v35, %v473_v29  ;;  %v1237_v29 = vld [vmem:[%s1796_s4 + $0x98] sm:$0xff]  ;;  %v886_v33 = vand.u32 3, %v832_v32 }
  0xf6   : > { %v1341_v39 = vpop.f32.mrf.mxu0 }
  0xf7   : > { %v481_v40 = vadd.f32 %v480_v38, %v475_v36  ;;  %v482_v41 = vadd.f32 %v480_v38, %v476_v37  ;;  %vm1662_vm13 = vcmp.eq.s32.totalorder %v886_v33, %v1525_v4  ;;  %v879_v36 = vand.u32 3, %v831_v34 }
  0xf8   : > { %v830_v37 = vadd.s32 40, %v1529_v7  ;;  %v1472_v38 = vmov 1.0  }
  0xf9   : > { %vm483_vm5 = vcmp.ge.f32.partialorder %v481_v40, 0.0  ;;  %v485_v42 = vmul.f32 0.2, %v481_v40  ;;  %v486_v44 = vmul.f32 0.2, %v482_v41  ;;  %vm484_vm6 = vcmp.ge.f32.partialorder %v482_v41, 0.0 }
  0xfa   : > { %vm1672_vm14 = vcmp.eq.s32.totalorder %v879_v36, %v1525_v4 }
  0xfb   : > { %v487_v43 = vsel %vm483_vm5, %v481_v40, %v485_v42  ;;  %v488_v45 = vsel %vm484_vm6, %v482_v41, %v486_v44  ;;  %v872_v40 = vand.u32 3, %v830_v37  ;;  %v829_v41 = vadd.s32 32, %v1529_v7 }
  0xfc   : > { %491 = vrot.lane.b32.xlu0 %v487_v43, %s1470_s11  ;;  %v828_v44 = vadd.s32 24, %v1529_v7  ;;  %vm823_vm6 = vcmask 523264  }
  0xfd   : > { %vm1682_vm15 = vcmp.eq.s32.totalorder %v872_v40, %v1525_v4  ;;  %v865_v43 = vand.u32 3, %v829_v41 }
 0x100   : > { %493 = vrot.lane.b32.xlu0 %v488_v45, %s1470_s11 }
 0x16e   : > { %v492_v46 = vpop.permute.xlu0 %491 }
 0x16f   : > { %498 = vst.msk [vmem:[#allocation2 + $0x1] sm:$0xff] %vm497_vm7, %v492_v46 }
 0x170   : > { %501 = vst.msk [vmem:[#allocation2] sm:$0x1] %vm500_vm8, %v492_v46  ;;  %v858_v46 = vand.u32 3, %v828_v44 }
 0x172   : > { %v494_v47 = vpop.permute.xlu0 %493  ;;  %vm1702_vm2 = vcmp.eq.s32.totalorder %v858_v46, %v1525_v4 }
 0x173   : > { %499 = vst.msk [vmem:[#allocation2 + $0x9] sm:$0xff] %vm497_vm7, %v494_v47 }
 0x174   : > { %503 = vst.msk [vmem:[#allocation2 + $0xa] sm:$0x80] %vm502_vm9, %v494_v47  ;;  %v827_v47 = vadd.s32 16, %v1529_v7 }
 0x176   : > { %v851_v49 = vand.u32 3, %v827_v47 }
 0x177   : > { %v504_v48 = vld [vmem:[#allocation2] sm:$0xff] }
 0x178   : > { %510 = vrot.lane.b32.xlu1 %v504_v48, %s1471_s16  ;;  %vm1712_vm3 = vcmp.eq.s32.totalorder %v851_v49, %v1525_v4 }
 0x17a   : > { %v505_v55 = vld [vmem:[#allocation2 + $0x8] sm:$0xff] }
 0x17b   : > { %v506_v54 = vld [vmem:[#allocation2 + $0x10] sm:$0x3] }
 0x17c   : > { %514 = vrot.lane.b32.xlu0 %v506_v54, %s1471_s16  ;;  %512 = vrot.lane.b32.xlu1 %v505_v55, %s1471_s16  ;;  %v837_v54 = vand.u32 3, %v1529_v7 }
 0x17e   : > { %vm1731_vm5 = vcmp.eq.s32.totalorder %v837_v54, %v1525_v4 }
 0x1ea   : > { %v511_v63 = vpop.permute.xlu1 %510 }
 0x1eb   : > { %519 = vst.msk [vmem:[#allocation2] sm:$0xff] %vm318_vm4, %v511_v63 }
 0x1ee   : > { %v515_v6 = vpop.permute.xlu0 %514  ;;  %v513_v8 = vpop.permute.xlu1 %512 }
 0x1ef   : > { %521 = vst.msk [vmem:[#allocation2 + $0x10] sm:$0x3] %vm267_vm1, %v515_v6  ;;  %vm1692_vm1 = vcmp.eq.s32.totalorder %v865_v43, %v1525_v4 }
 0x1f0   : > { %520 = vst.msk [vmem:[#allocation2 + $0x8] sm:$0xff] %vm318_vm4, %v513_v8  ;;  %vm1721_vm4 = vcmp.eq.s32.totalorder %v844_v52, %v1525_v4 }
 0x1f2   : > { %v522_v12 = vld [vmem:[#allocation2] sm:$0xff] }
 0x1f3   : > { %528 = vrot.lane.b32.xlu1 %v522_v12, %s1470_s11 }
 0x1f6   : > { %v524_v13 = vld [vmem:[#allocation2 + $0x10] sm:$0x3] }
 0x1f7   : > { %v523_v14 = vld [vmem:[#allocation2 + $0x8] sm:$0xff]  ;;  %532 = vrot.lane.b32.xlu1 %v524_v13, %s1470_s11 }
 0x1f8   : > { %530 = vrot.lane.b32.xlu0 %v523_v14, %s1470_s11  ;;  %s262_s11 = scalar_lea.vmem %s1798_s6, %s1217_s7 }
 0x265   : > { %v529_v15 = vpop.permute.xlu1 %528 }
 0x266   : > { %538 = vst.msk [vmem:[#allocation2] sm:$0xff] %vm537_vm10, %v529_v15 }
 0x269   : > { %v533_v17 = vpop.permute.xlu1 %532 }
 0x26a   : > { %v531_v16 = vpop.permute.xlu0 %530  ;;  %541 = vst.msk [vmem:[#allocation2 + $0x10] sm:$0x3] %vm540_vm11, %v533_v17 }
 0x26b   : > { %539 = vst.msk [vmem:[#allocation2 + $0x8] sm:$0xff] %vm537_vm10, %v531_v16 }
 0x26d   : > { %v542_v18 = vld [vmem:[#allocation2] sm:$0xff] }
 0x26e   : > { %1381 = vmatprep.mubr.msk.f32.mxu1 %vm565_vm12, %v542_v18 }
 0x272   : > { %v553_v19 = vld [vmem:[#allocation2 + $0x1] sm:$0xff]  ;;  %v554_v21 = vld [vmem:[#allocation2 + $0x9] sm:$0xff] }
 0x273   : > { %v543_v20 = vld [vmem:[#allocation2 + $0x8] sm:$0xff]  ;;  %1360 = vmatprep.mubr.msk.f32.mxu0 %vm565_vm12, %v553_v19 }
 0x274   : > { %1382 = vmatmul.mubr.msk.f32.vlgmr.msra.gmra.mxu1 %vm565_vm12, %v543_v20  ;;  %1361 = vmatmul.mubr.msk.f32.vlgmr.msra.gmra.mxu0 %vm565_vm12, %v554_v21  ;;  %v728_v23 = vld [vmem:[#allocation2 + $0x2] sm:$0xff]  ;;  %v729_v31 = vld [vmem:[#allocation2 + $0xa] sm:$0xff] }
 0x275   : > { %1421 = vmatprep.mubr.msk.f32.mxu1 %vm1468_vm0, %v1467_v2  ;;  %1385 = vmatpush3.msra.mxu0 %v1244_v11 }
 0x276   : > { %1402 = vmatprep.mubr.msk.f32.mxu0 %vm565_vm12, %v728_v23  ;;  %1386 = vmatprep.subr.mxu0 %v1243_v22 }
 0x277   : > { %1387 = vmatpush3.msra.mxu0 %v1243_v22  ;;  %1406 = vmatpush3.msk.msra.mxu1 %vm1662_vm13, %v1472_v38 }
 0x278   : > { %1388 = vmatprep.subr.mxu0 %v1242_v24  ;;  %1407 = vmatprep.subr.mxu1 %v1467_v2 }
 0x279   : > { %1389 = vmatpush3.msra.mxu0 %v1242_v24  ;;  %1408 = vmatpush3.msk.msra.mxu1 %vm1672_vm14, %v1472_v38 }
 0x27a   : > { %1390 = vmatprep.subr.mxu0 %v1241_v25  ;;  %1409 = vmatprep.subr.mxu1 %v1467_v2 }
 0x27b   : > { %1391 = vmatpush3.msra.mxu0 %v1241_v25  ;;  %1410 = vmatpush3.msk.msra.mxu1 %vm1682_vm15, %v1472_v38 }
 0x27c   : > { %1392 = vmatprep.subr.mxu0 %v1240_v26  ;;  %1411 = vmatprep.subr.mxu1 %v1467_v2 }
 0x27d   : > { %1393 = vmatpush3.msra.mxu0 %v1240_v26  ;;  %1412 = vmatpush3.msk.msra.mxu1 %vm1692_vm1, %v1472_v38 }
 0x27e   : > { %1394 = vmatprep.subr.mxu0 %v1239_v27  ;;  %1413 = vmatprep.subr.mxu1 %v1467_v2 }
 0x27f   : > { %1395 = vmatpush3.msra.mxu0 %v1239_v27  ;;  %1414 = vmatpush3.msk.msra.mxu1 %vm1702_vm2, %v1472_v38 }
 0x280   : > { %1396 = vmatprep.subr.mxu0 %v1238_v28  ;;  %1415 = vmatprep.subr.mxu1 %v1467_v2 }
 0x281   : > { %1397 = vmatpush3.msra.mxu0 %v1238_v28  ;;  %1416 = vmatpush3.msk.msra.mxu1 %vm1712_vm3, %v1472_v38 }
 0x282   : > { %1398 = vmatprep.subr.mxu0 %v1237_v29  ;;  %1417 = vmatprep.subr.mxu1 %v1467_v2 }
 0x283   : > { %1399 = vmatpush3.msra.mxu0 %v1237_v29  ;;  %1418 = vmatpush3.msk.msra.mxu1 %vm1721_vm4, %v1472_v38 }
 0x284   : > { %1400 = vmatprep.subr.mxu0 %v1236_v30  ;;  %1419 = vmatprep.subr.mxu1 %v1467_v2 }
 0x285   : > { %1401 = vmatpush3.msra.mxu0 %v1236_v30  ;;  %1420 = vmatpush3.msk.msra.mxu1 %vm1731_vm5, %v1472_v38 }
 0x286   : > { %1403 = vmatmul.mubr.msk.f32.vlgmr.msra.gmra.mxu0 %vm565_vm12, %v729_v31  ;;  %1424 = vmatprep.subr.mxu1 %v1467_v2 }
 0x334   : > { %v1383_v56 = vpop.f32.mrf.mxu1  ;;  %v1362_v57 = vpop.f32.mrf.mxu0 }
 0x335   : > { %v725_v59 = vadd.f32 %v1383_v56, %v1362_v57 }
 0x336   : > { %v719_v7 = vpop.f32.mrf.mxu1  ;;  %v638_v58 = vpop.f32.mrf.mxu0 }
 0x337   : > { %v720_v60 = vadd.f32 %v719_v7, %v638_v58 }
 0x346   : > { %v1404_v4 = vpop.f32.mrf.mxu0 }
 0x347   : > { %v822_v61 = vadd.f32 %v1404_v4, %v725_v59 }
 0x348   : > { %v812_v62 = vpop.f32.mrf.mxu0 }
 0x349   : > { %825 = vst.msk [vmem:[%s258_s30 + $0x8] sm:$0xff] %vm823_vm6, %v822_v61  ;;  %v821_v63 = vadd.f32 %v812_v62, %v720_v60  ;;  %v954_v0 = vsel %vm823_vm6, %v822_v61, 0.0  ;;  %v963_v1 = vmul.f32 %v822_v61, %v822_v61 }
 0x34b   : > { %824 = vst.msk [vmem:[%s258_s30] sm:$0xff] %vm823_vm6, %v821_v63  ;;  %v953_v3 = vsel %vm823_vm6, %v821_v63, 0.0  ;;  %v962_v5 = vmul.f32 %v821_v63, %v821_v63  ;;  %v965_v10 = vsel %vm823_vm6, %v963_v1, 0.0 }
 0x34c   : > { %v955_v6 = vadd.f32 %v954_v0, %v953_v3 }
 0x34d   : > { %v964_v8 = vsel %vm823_vm6, %v962_v5, 0.0 }
 0x34e   : > { %v956_v9 = vrot.slane %v955_v6, 4  ;;  %v966_v12 = vadd.f32 %v965_v10, %v964_v8 }
 0x350   : > { %v957_v11 = vadd.f32 %v956_v9, %v955_v6  ;;  %v967_v15 = vrot.slane %v966_v12, 4 }
 0x352   : > { %v958_v13 = vrot.slane %v957_v11, 2  ;;  %v968_v17 = vadd.f32 %v967_v15, %v966_v12 }
 0x354   : > { %v959_v14 = vadd.f32 %v958_v13, %v957_v11  ;;  %v969_v19 = vrot.slane %v968_v17, 2 }
 0x356   : > { %v960_v16 = vrot.slane %v959_v14, 1  ;;  %v970_v20 = vadd.f32 %v969_v19, %v968_v17 }
 0x358   : > { %v961_v18 = vadd.f32 %v960_v16, %v959_v14  ;;  %v971_v21 = vrot.slane %v970_v20, 1 }
 0x35a   : > { %1422 = vmatmul.mubr.msk.f32.vlgmr.msra.gmra.mxu1 %vm823_vm6, %v961_v18  ;;  %v972_v22 = vadd.f32 %v971_v21, %v970_v20 }
 0x35b   : > { %1425 = vmatpush3.msk.msra.mxu1 %vm1662_vm13, %v1472_v38  ;;  %1440 = vmatprep.mubr.msk.f32.mxu1 %vm1468_vm0, %v1467_v2  ;;  %vm1046_vm0 = vcmask 24576  }
 0x35c   : > { %1426 = vmatprep.subr.mxu1 %v1467_v2 }
 0x35d   : > { %1427 = vmatpush3.msk.msra.mxu1 %vm1672_vm14, %v1472_v38 }
 0x35e   : > { %1428 = vmatprep.subr.mxu1 %v1467_v2 }
 0x35f   : > { %1429 = vmatpush3.msk.msra.mxu1 %vm1682_vm15, %v1472_v38 }
 0x360   : > { %1430 = vmatprep.subr.mxu1 %v1467_v2 }
 0x361   : > { %1431 = vmatpush3.msk.msra.mxu1 %vm1692_vm1, %v1472_v38 }
 0x362   : > { %1432 = vmatprep.subr.mxu1 %v1467_v2 }
 0x363   : > { %1433 = vmatpush3.msk.msra.mxu1 %vm1702_vm2, %v1472_v38 }
 0x364   : > { %1434 = vmatprep.subr.mxu1 %v1467_v2 }
 0x365   : > { %1435 = vmatpush3.msk.msra.mxu1 %vm1712_vm3, %v1472_v38 }
 0x366   : > { %1436 = vmatprep.subr.mxu1 %v1467_v2 }
 0x367   : > { %1437 = vmatpush3.msk.msra.mxu1 %vm1721_vm4, %v1472_v38 }
 0x368   : > { %1438 = vmatprep.subr.mxu1 %v1467_v2 }
 0x369   : > { %1439 = vmatpush3.msk.msra.mxu1 %vm1731_vm5, %v1472_v38 }
 0x36a   : > { %1441 = vmatmul.mubr.msk.f32.vlgmr.msra.gmra.mxu1 %vm823_vm6, %v972_v22 }
 0x41a   : > { %v1042_v23 = vpop.f32.mrf.mxu1 }
 0x41b   : > { %1047 = vst.msk [vmem:[%s262_s11] sm:$0x1] %vm1046_vm0, %v1042_v23 }
 0x41c   : > { %v1423_v24 = vpop.f32.mrf.mxu1 }
 0x42a   : > { %v1117_v25 = vpop.f32.mrf.mxu1 }
 0x42b   : > { %1121 = vst.msk [vmem:[%s262_s11 + $0x1] sm:$0x1] %vm1046_vm0, %v1117_v25 }
 0x42c   : > { %v1442_v26 = vpop.f32.mrf.mxu1 }
 0x42d PF: > { %s17_s21 = sadd.s32 1, %s1465_s21  }
 0x42e   : > { %p14_p4 = scmp.ge.s32.totalorder %s17_s21, 4  }
 0x430   :  { %16 = sbr.rel (!%p14_p4) target bundleno = 1 (0x1), region = 84 }

// kernel: unet_conv_forward.5
= control target key start
LH: loop header
LB: loop body
LE: loop exit
PB: predicated region body
PF: predicated region fallthrough
CT: control target
= control target key end

     0   :  { %s544_s15 = smov 0   ;;  %s577_s0 = inlined_call_operand.vmem [shape: f32[2,8,128], index: 0, kind: input, shape index: {}]   ;;  %s578_s1 = inlined_call_operand.vmem [shape: f32[2,2,4], index: 1, kind: input, shape index: {}]   ;;  %s579_s2 = inlined_call_operand.vmem [shape: f32[1,4], index: 2, kind: input, shape index: {}]   ;;  %s580_s3 = inlined_call_operand.vmem [shape: f32[1,4], index: 3, kind: input, shape index: {}]   ;;  %s581_s4 = inlined_call_operand.vmem [shape: f32[2,8,128], index: 4, kind: output, shape index: {}]  }
   0x1 LB: > { %s467_s16 = sadd.s32 4294967295, %s514_s15   ;;  %p471_p0 = scmp.ge.s32.totalorder %s514_s15, 1  ;;  %s514_s15 = sphi %s544_s15, %s14_s15  }
   0x2   : > { %p161_p1 = scmp.lt.s32.totalorder %s514_s15, 3 }
   0x4   : > { %p162_p2 = pnand %p471_p0, %p161_p1 }
   0x5   : > { %p185_p3 = scmp.lt.s32.totalorder (!%p162_p2), %s467_s16, 1 }
   0x6   : > { %165 = sbr.rel (%p162_p2) target bundleno = 253 (0xfd), region = 36 }
   0xb   : > { %v213_v0 = vlaneseq  ;;  %v193_v1 = vld [vmem:[%s578_s1] sm:$0x3]  ;;  %v516_v2 = vmov 0.0   ;;  %vm517_vm0 = vmmov 0   ;;  %v194_v3 = vld [vmem:[%s578_s1 + $0x2] sm:$0x3] }
   0xc   : > { %485 = vmatprep.subr.mxu0 %v516_v2  ;;  %487 = vmatprep.mubr.msk.f32.mxu0 %vm517_vm0, %v516_v2  ;;  %vm197_vm1 = vcmask 25600   ;;  %vm252_vm2 = vcmask 1043456   ;;  %v518_v16 = vmov 1966171168   ;;  %v195_v23 = vld [vmem:[%s579_s2] sm:$0x1] }
   0xd   : > { %v232_v4 = vand.u32 127, %v213_v0  ;;  %v198_v5 = vsel %vm197_vm1, %v193_v1, 0.0  ;;  %v199_v6 = vsel %vm197_vm1, %v194_v3, 0.0  ;;  %490 = vmatprep.subr.mxu1 %v516_v2  ;;  %492 = vmatprep.mubr.msk.f32.mxu1 %vm517_vm0, %v516_v2  ;;  %v214_v8 = vshrl.u32 %v213_v0, 7  ;;  %v196_v26 = vld [vmem:[%s580_s3] sm:$0x1] }
   0xe   : > { %v200_v7 = vadd.f32 %v199_v6, %v198_v5  ;;  %v211_v17 = vunpack.c.l.s4 %v518_v16  ;;  %vm248_vm4 = vcmask 31744   ;;  %s583_s16 = smov (!%p185_p3, %s467_s16), 1 }
   0xf   : > { %v237_v9 = vand.u32 3, %v232_v4  ;;  %s472_s25 = sshll.u32 %s583_s16, 3  ;;  %v402_v29 = vsub.s32 0, %v214_v8 }
  0x10   : > { %v201_v10 = vmul.f32 0.001953125, %v200_v7  ;;  %v212_v18 = vunpack.c.0.s8 %v211_v17  ;;  %s188_s28 = scalar_lea.vmem %s577_s0, %s472_s25  ;;  %s192_s5 = scalar_lea.vmem %s581_s4, %s472_s25 }
  0x11   : > { %vm245_vm3 = vcmp.eq.s32.totalorder %v237_v9, %v214_v8  ;;  %v399_v31 = vld [vmem:[%s188_s28] sm:$0xff] }
  0x12   : > { %v474_v11 = vsel %vm245_vm3, 1.0, %v516_v2  ;;  %v202_v12 = vmul.f32 %v201_v10, %v201_v10  ;;  %v215_v19 = vsub.s32 %v212_v18, %v214_v8 }
  0x13   : > { %486 = vmatpush3.msk.msra.mxu0 %vm252_vm2, %v474_v11  ;;  %491 = vmatpush3.msk.msra.mxu1 %vm252_vm2, %v474_v11 }
  0x14   : > { %v204_v13 = vrot.slane %v202_v12, 7 }
  0x16   : > { %v206_v14 = vsub.f32 %v201_v10, %v204_v13 }
  0x18   : > { %v207_v15 = vadd.f32 1e-05, %v206_v14 }
  0x1a   : > { %506 = vrsqrt.f32 %v207_v15 }
  0x27   : > { %v507_v20 = vpop.eup %506 }
  0x28   : > { %v216_v21 = vrot.slane %v507_v20, %v215_v19 }
  0x2a   : > { %v217_v22 = vcombine.high %v216_v21, %v216_v21 }
  0x2c   : > { %v224_v24 = vrot.slane %v217_v22, %v215_v19 }
  0x2e   : > { %v226_v25 = vmul.f32 %v224_v24, %v195_v23 }
  0x30   : > { %488 = vmatmul.mubr.msk.f32.vlgmr.msra.gmra.mxu0 %vm248_vm4, %v226_v25  ;;  %v227_v27 = vmul.f32 %v226_v25, %v201_v10 }
  0x32   : > { %v228_v28 = vsub.f32 %v196_v26, %v227_v27 }
  0x34   : > { %493 = vmatmul.mubr.msk.f32.vlgmr.msra.gmra.mxu1 %vm248_vm4, %v228_v28 }
  0xf0   : > { %v322_v30 = vpop.f32.mrf.mxu0 }
  0xf1   : > { %v403_v32 = vrot.slane %v322_v30, %v402_v29 }
  0xf2   : > { %v489_v33 = vpop.f32.mrf.mxu0 }
  0xf3   : > { %v404_v34 = vmul.f32 %v403_v32, %v399_v31 }
  0xf4   : > { %v395_v35 = vpop.f32.mrf.mxu1 }
  0xf5   : > { %v408_v36 = vrot.slane %v395_v35, %v402_v29 }
  0xf6   : > { %v494_v37 = vpop.f32.mrf.mxu1 }
  0xf7   : > { %v409_v38 = vadd.f32 %v408_v36, %v404_v34 }
  0xf9   : > { %vm410_vm5 = vcmp.ge.f32.partialorder %v409_v38, 0.0  ;;  %v411_v39 = vmul.f32 0.2, %v409_v38 }
  0xfb   : > { %v412_v40 = vsel %vm410_vm5, %v409_v38, %v411_v39 }
  0xfc   : > { %413 = vst [vmem:[%s192_s5] sm:$0xff] %v412_v40 }
  0xfd PF: > { %s14_s15 = sadd.s32 1, %s514_s15  }
  0xfe   : > { %p11_p4 = scmp.ge.s32.totalorder %s14_s15, 4  }
 0x100   :  { %13 = sbr.rel (!%p11_p4) target bundleno = 1 (0x1), region = 66 }

</bundles_post_ra>
